<compile_context>
chip_gen: v5e
topology: v5e:2x2
jax: 0.10.0
libtpu: 0.0.40
codegen_flags: <defaults>
</compile_context>

<pallas_src>
import functools

import jax
import jax.numpy as jnp
from jax import lax
from jax.experimental import pallas as pl
from jax.experimental.pallas import tpu as pltpu

EPS = 1e-5
NEG_SLOPE = 0.01
_LANE = 128        # lane tile
_SUB_BF16 = 16     # bf16 sublane packing


def _round_up(x, m):
    return (x + m - 1) // m * m


def _vmem_limit_bytes():
    cap = 64 << 20                       # safe default (v7x per-core VMEM)
    try:
        info = pltpu.get_tpu_info()
        cap = int(getattr(info, "vmem_capacity_bytes", cap) or cap)
    except Exception:
        pass
    return max(32 << 20, int(cap * 0.8))


# ----------------------------- Pallas kernel ------------------------------

def _conv_in_lrelu_kernel(x_ref, w_ref, g_ref, bt_ref, *rest,
                          stride, k9p, s_real, add_residual):
    """Per-sample fused 3x3x3 conv -> InstanceNorm(affine) -> (+res) -> LeakyReLU.

    x_ref : (1, Dp*K9p, Sp) bf16  (kh,kw)-column slab; depth taps are taken
                                  in-kernel by slicing 3 consecutive K9p rows
                                  -> one K = 3*K9p matmul per output plane.
    w_ref : (Co, 3*K9p)     bf16  packed weights, K ordered (kd, kh, kw, ci).
    g/bt  : (Co, 1)         f32   InstanceNorm affine.
    r_ref : (1, Do*Co, Sp)  bf16  residual (only when add_residual).
    o_ref : (1, Do*Co, Sp)        pre-norm written in pass 1, normalized in
                                  place in pass 2 (no f32 scratch).
    Conv bias is omitted: a per-channel constant is exactly cancelled by
    InstanceNorm's per-channel mean subtraction.
    """
    if add_residual:
        r_ref, o_ref = rest
    else:
        (o_ref,) = rest

    co = g_ref.shape[0]
    do = o_ref.shape[1] // co
    npair = do // 2
    unroll = True if npair <= 8 else 2

    w = w_ref[...]                                      # loop-invariant load

    def conv_plane(d):
        # One long-K matmul: (Co, 3*K9p) @ (3*K9p, Sp) -> (Co, Sp) f32.
        start = pl.multiple_of(d * (stride * k9p), k9p)
        xs = x_ref[0, pl.ds(start, 3 * k9p), :]
        return jnp.dot(w, xs, preferred_element_type=jnp.float32)

    # ---- pass 1: conv, f32 sum/sumsq, bf16 pre-norm written into o_ref ----
    # Two depth planes per step -> (2*Co, Sp) stores (>=16 sublanes for bf16).
    def pair_body(i, carry):
        s_, sq_ = carry
        d0 = 2 * i
        y0 = conv_plane(d0)
        y1 = conv_plane(d0 + 1)
        s_ = s_ + jnp.sum(y0, axis=1, keepdims=True) \
                + jnp.sum(y1, axis=1, keepdims=True)
        sq_ = sq_ + jnp.sum(y0 * y0, axis=1, keepdims=True) \
                  + jnp.sum(y1 * y1, axis=1, keepdims=True)
        row = pl.multiple_of(d0 * co, 2 * co)
        o_ref[0, pl.ds(row, 2 * co), :] = (
            jnp.concatenate([y0, y1], axis=0).astype(o_ref.dtype))
        return s_, sq_

    zeros = jnp.zeros((co, 1), jnp.float32)
    s_, sq_ = lax.fori_loop(0, npair, pair_body, (zeros, zeros), unroll=unroll)

    if do % 2 == 1:                                     # static tail plane
        y = conv_plane(do - 1)
        s_ = s_ + jnp.sum(y, axis=1, keepdims=True)
        sq_ = sq_ + jnp.sum(y * y, axis=1, keepdims=True)
        o_ref[0, pl.ds((do - 1) * co, co), :] = y.astype(o_ref.dtype)

    # Zero-padded lanes / K columns contribute exactly 0 to the sums, so
    # dividing by the true voxel count keeps the statistics exact.
    n_vox = float(do * s_real)
    mean = s_ / n_vox
    var = jnp.maximum(sq_ / n_vox - mean * mean, 0.0)   # clamp f32 cancellation
    scale = g_ref[...] * lax.rsqrt(var + EPS)
    shift = bt_ref[...] - mean * scale

    # ---- pass 2: in-place normalize + affine (+residual) + LeakyReLU ----
    scale2 = jnp.concatenate([scale, scale], axis=0)    # (2*Co, 1)
    shift2 = jnp.concatenate([shift, shift], axis=0)

    def norm_pair(i, carry):
        row = pl.multiple_of(2 * i * co, 2 * co)
        z = o_ref[0, pl.ds(row, 2 * co), :].astype(jnp.float32) * scale2 + shift2
        if add_residual:
            z = z + r_ref[0, pl.ds(row, 2 * co), :].astype(jnp.float32)
        o_ref[0, pl.ds(row, 2 * co), :] = (
            jnp.where(z >= 0.0, z, NEG_SLOPE * z).astype(o_ref.dtype))
        return carry

    lax.fori_loop(0, npair, norm_pair, 0, unroll=unroll)

    if do % 2 == 1:
        row = (do - 1) * co
        z = o_ref[0, pl.ds(row, co), :].astype(jnp.float32) * scale + shift
        if add_residual:
            z = z + r_ref[0, pl.ds(row, co), :].astype(jnp.float32)
        o_ref[0, pl.ds(row, co), :] = (
            jnp.where(z >= 0.0, z, NEG_SLOPE * z).astype(o_ref.dtype))


def _fused_conv_in_lrelu(xcol, w_pk, g, bt, *, stride, k9p, do, ho, wo,
                         residual=None, out_dtype=jnp.bfloat16):
    """Grid over batch; one sample per step (parallel across TensorCores)."""
    n, dpk, sp = xcol.shape
    co = int(g.shape[0])
    vec = lambda v: v.reshape(co, 1).astype(jnp.float32)

    in_specs = [
        pl.BlockSpec((1, dpk, sp), lambda i: (i, 0, 0)),       # column slab
        pl.BlockSpec(tuple(w_pk.shape), lambda i: (0, 0)),     # packed weights
        pl.BlockSpec((co, 1), lambda i: (0, 0)),               # gamma
        pl.BlockSpec((co, 1), lambda i: (0, 0)),               # beta
    ]
    args = [xcol, w_pk, vec(g), vec(bt)]
    if residual is not None:
        in_specs.append(pl.BlockSpec((1, do * co, sp), lambda i: (i, 0, 0)))
        args.append(residual)

    kernel = functools.partial(
        _conv_in_lrelu_kernel, stride=stride, k9p=k9p, s_real=ho * wo,
        add_residual=residual is not None)

    return pl.pallas_call(
        kernel,
        out_shape=jax.ShapeDtypeStruct((n, do * co, sp), out_dtype),
        grid=(n,),
        in_specs=in_specs,
        out_specs=pl.BlockSpec((1, do * co, sp), lambda i: (i, 0, 0)),
        compiler_params=pltpu.CompilerParams(
            dimension_semantics=("parallel",),
            vmem_limit_bytes=_vmem_limit_bytes()),
    )(*args)


# ------------------------------ JAX glue -----------------------------------

def _col_slab(x_dcf, stride):
    """(N, D, C, H, W) depth-major activations -> bf16 (N, Dp*K9p, Sp) slab.

    Only the 9 (kh, kw) taps are expanded (bf16); the 3 depth taps are taken
    in-kernel, so HBM sees a 9x bf16 slab instead of a 27x f32 im2col.  K9 is
    zero-padded to the bf16 sublane tile and Ho*Wo to the lane tile so every
    kernel load/store is unmasked and the stats see exact zeros in padding.
    """
    n, d, c, h, w = x_dcf.shape
    do = (d - 1) // stride + 1
    ho = (h - 1) // stride + 1
    wo = (w - 1) // stride + 1
    k9 = 9 * c
    k9p = _round_up(k9, _SUB_BF16)
    s = ho * wo
    sp = _round_up(s, _LANE)

    xp = jnp.pad(x_dcf.astype(jnp.bfloat16),
                 ((0, 0), (1, 1), (0, 0), (1, 1), (1, 1)))
    cols = []
    for kh in range(3):
        for kw in range(3):
            cols.append(xp[:, :, :,
                           kh:kh + stride * (ho - 1) + 1:stride,
                           kw:kw + stride * (wo - 1) + 1:stride])
    xcol = jnp.stack(cols, axis=2)                     # (N, Dp, 9, C, Ho, Wo)
    xcol = xcol.reshape(n, d + 2, k9, s)
    xcol = jnp.pad(xcol, ((0, 0), (0, 0), (0, k9p - k9), (0, sp - s)))
    xcol = xcol.reshape(n, (d + 2) * k9p, sp)
    return xcol, (do, ho, wo, k9p, sp)


def _pack_w(w, k9p):
    """(3,3,3,Ci,Co) -> bf16 (Co, 3*K9p); K ordered (kd, kh, kw, ci), 0-padded."""
    kd, kh, kw, ci, co = w.shape
    k9 = kh * kw * ci
    wt = w.transpose(0, 4, 1, 2, 3).reshape(kd, co, k9)
    wt = jnp.pad(wt, ((0, 0), (0, 0), (0, k9p - k9)))
    wt = wt.transpose(1, 0, 2).reshape(co, kd * k9p)
    return wt.astype(jnp.bfloat16)


@jax.jit
def encoder_block_forward(x_ncdhw, params):
    """x: (N, Ci, D, H, W) f32 NCDHW. Returns (N, Co, Do, Ho, Wo) f32 NCDHW."""
    n = x_ncdhw.shape[0]
    co = params["w0"].shape[-1]

    # One-time layout change; all inter-conv tensors stay depth-major.
    x_dcf = jnp.transpose(x_ncdhw, (0, 2, 1, 3, 4))          # (N, D, Ci, H, W)

    # --- ConvDropoutNormReLU: conv(stride 2) -> IN -> LeakyReLU ---
    xc0, (do, ho, wo, k9p0, sp) = _col_slab(x_dcf, stride=2)
    y0 = _fused_conv_in_lrelu(xc0, _pack_w(params["w0"], k9p0),
                              params["g0"], params["bt0"],
                              stride=2, k9p=k9p0, do=do, ho=ho, wo=wo)

    def unpack(y):   # (N, Do*Co, Sp) -> (N, Do, Co, Ho, Wo); no transpose
        return y.reshape(n, do, co, sp)[..., :ho * wo].reshape(n, do, co, ho, wo)

    # --- ResidualBlock (identity skip: stride 1, in_ch == out_ch) ---
    xc1, (_, _, _, k9p1, _) = _col_slab(unpack(y0), stride=1)
    y1 = _fused_conv_in_lrelu(xc1, _pack_w(params["w1"], k9p1),
                              params["g1"], params["bt1"],
                              stride=1, k9p=k9p1, do=do, ho=ho, wo=wo)

    xc2, (_, _, _, k9p2, _) = _col_slab(unpack(y1), stride=1)
    y2 = _fused_conv_in_lrelu(xc2, _pack_w(params["w2"], k9p2),
                              params["g2"], params["bt2"],
                              stride=1, k9p=k9p2, do=do, ho=ho, wo=wo,
                              residual=y0)

    out = unpack(y2)                                          # bf16
    return jnp.transpose(out, (0, 2, 1, 3, 4)).astype(jnp.float32)


# ---------------------------- pure-JAX reference ---------------------------

def _ref_conv_in(x, w, b, g, bt, stride):
    y = lax.conv_general_dilated(
        x, w, (stride,) * 3, [(1, 1)] * 3,
        dimension_numbers=("NCDHW", "DHWIO", "NCDHW"),
        precision=lax.Precision.HIGHEST)
    y = y + b.reshape(1, -1, 1, 1, 1)
    mean = y.mean(axis=(2, 3, 4), keepdims=True)
    var = ((y - mean) ** 2).mean(axis=(2, 3, 4), keepdims=True)
    yn = (y - mean) / jnp.sqrt(var + EPS)
    return yn * g.reshape(1, -1, 1, 1, 1) + bt.reshape(1, -1, 1, 1, 1)


def _lrelu(x):
    return jnp.where(x >= 0, x, NEG_SLOPE * x)


def encoder_block_reference(x, params):
    y0 = _lrelu(_ref_conv_in(x, params["w0"], params["b0"],
                             params["g0"], params["bt0"], 2))
    y1 = _lrelu(_ref_conv_in(y0, params["w1"], params["b1"],
                             params["g1"], params["bt1"], 1))
    y2 = _ref_conv_in(y1, params["w2"], params["b2"],
                      params["g2"], params["bt2"], 1)
    return _lrelu(y2 + y0)


# --------------------------------- main ------------------------------------

def _init_params(key, ci, co):
    ks = jax.random.split(key, 12)
    n = lambda k, s, sc: sc * jax.random.normal(k, s, jnp.float32)
    return {
        "w0": n(ks[0], (3, 3, 3, ci, co), 0.1), "b0": n(ks[1], (co,), 0.05),
        "g0": 1.0 + n(ks[2], (co,), 0.1),       "bt0": n(ks[3], (co,), 0.05),
        "w1": n(ks[4], (3, 3, 3, co, co), 0.1), "b1": n(ks[5], (co,), 0.05),
        "g1": 1.0 + n(ks[6], (co,), 0.1),       "bt1": n(ks[7], (co,), 0.05),
        "w2": n(ks[8], (3, 3, 3, co, co), 0.1), "b2": n(ks[9], (co,), 0.05),
        "g2": 1.0 + n(ks[10], (co,), 0.1),      "bt2": n(ks[11], (co,), 0.05),
    }


if __name__ == "__main__":
    key = jax.random.PRNGKey(0)
    kx, kp = jax.random.split(key)

    N, Ci, Co, D = 2, 4, 8, 8                    # small stage-0 config, NCDHW
    x = jax.random.normal(kx, (N, Ci, D, D, D), jnp.float32)
    params = _init_params(kp, Ci, Co)

    out = jax.block_until_ready(encoder_block_forward(x, params))
    ref = jax.block_until_ready(encoder_block_reference(x, params))

    assert out.shape == (N, Co, D // 2, D // 2, D // 2), out.shape
    # bf16 MXU / bf16 activations end-to-end vs. f32 HIGHEST reference.
    max_err = float(jnp.max(jnp.abs(out - ref)))
    assert jnp.allclose(out, ref, atol=1e-1, rtol=1e-1), max_err

    print("KERNEL_OK")
</pallas_src>

<mosaic_0001>
module attributes {stable_mosaic.version = 11 : i64} {
  func.func @_conv_in_lrelu_kernel(%arg0: i32, %arg1: memref<1x480x128xbf16, #tpu.memory_space<vmem>>, %arg2: memref<8x144xbf16, #tpu.memory_space<vmem>>, %arg3: memref<8x1xf32, #tpu.memory_space<vmem>>, %arg4: memref<8x1xf32, #tpu.memory_space<vmem>>, %arg5: memref<1x32x128xbf16, #tpu.memory_space<vmem>>) attributes {dimension_semantics = [#tpu.dimension_semantics<parallel>], iteration_bounds = array<i64: 2>, scalar_prefetch = 0 : i64, scratch_operands = 0 : i64, tpu.core_type = #tpu.core_type<tc>, window_params = [{transform_indices = @transform_0, window_bounds = array<i64: 1, 480, 128>}, {pipeline_mode = #tpu.pipeline_mode<synchronous>, transform_indices = @transform_1, window_bounds = array<i64: 8, 144>}, {pipeline_mode = #tpu.pipeline_mode<synchronous>, transform_indices = @transform_2, window_bounds = array<i64: 8, 1>}, {pipeline_mode = #tpu.pipeline_mode<synchronous>, transform_indices = @transform_3, window_bounds = array<i64: 8, 1>}, {transform_indices = @transform_4, window_bounds = array<i64: 1, 32, 128>}]} {
    %c0 = arith.constant 0 : index
    %c0_0 = arith.constant 0 : index
    %0 = vector.load %arg2[%c0, %c0_0] : memref<8x144xbf16, #tpu.memory_space<vmem>>, vector<8x144xbf16>
    %cst = arith.constant 0.000000e+00 : f32
    %1 = vector.broadcast %cst : f32 to vector<8x1xf32>
    %c0_i32 = arith.constant 0 : i32
    %c2_i32 = arith.constant 2 : i32
    %2 = arith.muli %c2_i32, %c0_i32 : i32
    %c96_i32 = arith.constant 96 : i32
    %3 = arith.muli %2, %c96_i32 : i32
    %4 = tpu.assume_multiple %3, 48 : i32
    %c0_1 = arith.constant 0 : index
    %5 = arith.index_cast %4 : i32 to index
    %c0_2 = arith.constant 0 : index
    %6 = vector.load %arg1[%c0_1, %5, %c0_2] : memref<1x480x128xbf16, #tpu.memory_space<vmem>>, vector<1x144x128xbf16>
    %7 = vector.shape_cast %6 : vector<1x144x128xbf16> to vector<144x128xbf16>
    %cst_3 = arith.constant dense<0.000000e+00> : vector<8x128xf32>
    %8 = tpu.matmul %0, %7, %cst_3 {dimension_numbers = #tpu.dot_dimension_numbers<[1], [0], [0], [1], [0, 0, 1, 1], [], []>} : vector<8x144xbf16>, vector<144x128xbf16>, vector<8x128xf32> -> vector<8x128xf32>
    %c1_i32 = arith.constant 1 : i32
    %9 = arith.addi %2, %c1_i32 : i32
    %c96_i32_4 = arith.constant 96 : i32
    %10 = arith.muli %9, %c96_i32_4 : i32
    %11 = tpu.assume_multiple %10, 48 : i32
    %c0_5 = arith.constant 0 : index
    %12 = arith.index_cast %11 : i32 to index
    %c0_6 = arith.constant 0 : index
    %13 = vector.load %arg1[%c0_5, %12, %c0_6] : memref<1x480x128xbf16, #tpu.memory_space<vmem>>, vector<1x144x128xbf16>
    %14 = vector.shape_cast %13 : vector<1x144x128xbf16> to vector<144x128xbf16>
    %cst_7 = arith.constant dense<0.000000e+00> : vector<8x128xf32>
    %15 = tpu.matmul %0, %14, %cst_7 {dimension_numbers = #tpu.dot_dimension_numbers<[1], [0], [0], [1], [0, 0, 1, 1], [], []>} : vector<8x144xbf16>, vector<144x128xbf16>, vector<8x128xf32> -> vector<8x128xf32>
    %cst_8 = arith.constant dense<0.000000e+00> : vector<8xf32>
    %16 = vector.multi_reduction <add>, %8, %cst_8 [1] : vector<8x128xf32> to vector<8xf32>
    %17 = vector.shape_cast %16 : vector<8xf32> to vector<8x1xf32>
    %18 = arith.addf %1, %17 : vector<8x1xf32>
    %cst_9 = arith.constant dense<0.000000e+00> : vector<8xf32>
    %19 = vector.multi_reduction <add>, %15, %cst_9 [1] : vector<8x128xf32> to vector<8xf32>
    %20 = vector.shape_cast %19 : vector<8xf32> to vector<8x1xf32>
    %21 = arith.addf %18, %20 : vector<8x1xf32>
    %22 = arith.mulf %8, %8 : vector<8x128xf32>
    %cst_10 = arith.constant dense<0.000000e+00> : vector<8xf32>
    %23 = vector.multi_reduction <add>, %22, %cst_10 [1] : vector<8x128xf32> to vector<8xf32>
    %24 = vector.shape_cast %23 : vector<8xf32> to vector<8x1xf32>
    %25 = arith.addf %1, %24 : vector<8x1xf32>
    %26 = arith.mulf %15, %15 : vector<8x128xf32>
    %cst_11 = arith.constant dense<0.000000e+00> : vector<8xf32>
    %27 = vector.multi_reduction <add>, %26, %cst_11 [1] : vector<8x128xf32> to vector<8xf32>
    %28 = vector.shape_cast %27 : vector<8xf32> to vector<8x1xf32>
    %29 = arith.addf %25, %28 : vector<8x1xf32>
    %c8_i32 = arith.constant 8 : i32
    %30 = arith.muli %2, %c8_i32 : i32
    %31 = tpu.assume_multiple %30, 16 : i32
    %32 = tpu.concatenate %8, %15 in 0 : vector<8x128xf32>, vector<8x128xf32> -> vector<16x128xf32>
    %33 = arith.truncf %32 : vector<16x128xf32> to vector<16x128xbf16>
    %c0_12 = arith.constant 0 : index
    %34 = arith.index_cast %31 : i32 to index
    %c0_13 = arith.constant 0 : index
    %35 = vector.load %arg5[%c0_12, %34, %c0_13] : memref<1x32x128xbf16, #tpu.memory_space<vmem>>, vector<1x16x128xbf16>
    %36 = vector.shape_cast %35 : vector<1x16x128xbf16> to vector<16x128xbf16>
    %37 = vector.shape_cast %33 : vector<16x128xbf16> to vector<1x16x128xbf16>
    tpu.vector_store %arg5[%c0_12, %34, %c0_13], %37 {strides = array<i32>} : memref<1x32x128xbf16, #tpu.memory_space<vmem>>, vector<1x16x128xbf16>,
    %c1_i32_14 = arith.constant 1 : i32
    %c2_i32_15 = arith.constant 2 : i32
    %38 = arith.muli %c2_i32_15, %c1_i32_14 : i32
    %c96_i32_16 = arith.constant 96 : i32
    %39 = arith.muli %38, %c96_i32_16 : i32
    %40 = tpu.assume_multiple %39, 48 : i32
    %c0_17 = arith.constant 0 : index
    %41 = arith.index_cast %40 : i32 to index
    %c0_18 = arith.constant 0 : index
    %42 = vector.load %arg1[%c0_17, %41, %c0_18] : memref<1x480x128xbf16, #tpu.memory_space<vmem>>, vector<1x144x128xbf16>
    %43 = vector.shape_cast %42 : vector<1x144x128xbf16> to vector<144x128xbf16>
    %cst_19 = arith.constant dense<0.000000e+00> : vector<8x128xf32>
    %44 = tpu.matmul %0, %43, %cst_19 {dimension_numbers = #tpu.dot_dimension_numbers<[1], [0], [0], [1], [0, 0, 1, 1], [], []>} : vector<8x144xbf16>, vector<144x128xbf16>, vector<8x128xf32> -> vector<8x128xf32>
    %c1_i32_20 = arith.constant 1 : i32
    %45 = arith.addi %38, %c1_i32_20 : i32
    %c96_i32_21 = arith.constant 96 : i32
    %46 = arith.muli %45, %c96_i32_21 : i32
    %47 = tpu.assume_multiple %46, 48 : i32
    %c0_22 = arith.constant 0 : index
    %48 = arith.index_cast %47 : i32 to index
    %c0_23 = arith.constant 0 : index
    %49 = vector.load %arg1[%c0_22, %48, %c0_23] : memref<1x480x128xbf16, #tpu.memory_space<vmem>>, vector<1x144x128xbf16>
    %50 = vector.shape_cast %49 : vector<1x144x128xbf16> to vector<144x128xbf16>
    %cst_24 = arith.constant dense<0.000000e+00> : vector<8x128xf32>
    %51 = tpu.matmul %0, %50, %cst_24 {dimension_numbers = #tpu.dot_dimension_numbers<[1], [0], [0], [1], [0, 0, 1, 1], [], []>} : vector<8x144xbf16>, vector<144x128xbf16>, vector<8x128xf32> -> vector<8x128xf32>
    %cst_25 = arith.constant dense<0.000000e+00> : vector<8xf32>
    %52 = vector.multi_reduction <add>, %44, %cst_25 [1] : vector<8x128xf32> to vector<8xf32>
    %53 = vector.shape_cast %52 : vector<8xf32> to vector<8x1xf32>
    %54 = arith.addf %21, %53 : vector<8x1xf32>
    %cst_26 = arith.constant dense<0.000000e+00> : vector<8xf32>
    %55 = vector.multi_reduction <add>, %51, %cst_26 [1] : vector<8x128xf32> to vector<8xf32>
    %56 = vector.shape_cast %55 : vector<8xf32> to vector<8x1xf32>
    %57 = arith.addf %54, %56 : vector<8x1xf32>
    %58 = arith.mulf %44, %44 : vector<8x128xf32>
    %cst_27 = arith.constant dense<0.000000e+00> : vector<8xf32>
    %59 = vector.multi_reduction <add>, %58, %cst_27 [1] : vector<8x128xf32> to vector<8xf32>
    %60 = vector.shape_cast %59 : vector<8xf32> to vector<8x1xf32>
    %61 = arith.addf %29, %60 : vector<8x1xf32>
    %62 = arith.mulf %51, %51 : vector<8x128xf32>
    %cst_28 = arith.constant dense<0.000000e+00> : vector<8xf32>
    %63 = vector.multi_reduction <add>, %62, %cst_28 [1] : vector<8x128xf32> to vector<8xf32>
    %64 = vector.shape_cast %63 : vector<8xf32> to vector<8x1xf32>
    %65 = arith.addf %61, %64 : vector<8x1xf32>
    %c8_i32_29 = arith.constant 8 : i32
    %66 = arith.muli %38, %c8_i32_29 : i32
    %67 = tpu.assume_multiple %66, 16 : i32
    %68 = tpu.concatenate %44, %51 in 0 : vector<8x128xf32>, vector<8x128xf32> -> vector<16x128xf32>
    %69 = arith.truncf %68 : vector<16x128xf32> to vector<16x128xbf16>
    %c0_30 = arith.constant 0 : index
    %70 = arith.index_cast %67 : i32 to index
    %c0_31 = arith.constant 0 : index
    %71 = vector.load %arg5[%c0_30, %70, %c0_31] : memref<1x32x128xbf16, #tpu.memory_space<vmem>>, vector<1x16x128xbf16>
    %72 = vector.shape_cast %71 : vector<1x16x128xbf16> to vector<16x128xbf16>
    %73 = vector.shape_cast %69 : vector<16x128xbf16> to vector<1x16x128xbf16>
    tpu.vector_store %arg5[%c0_30, %70, %c0_31], %73 {strides = array<i32>} : memref<1x32x128xbf16, #tpu.memory_space<vmem>>, vector<1x16x128xbf16>,
    %c2_i32_32 = arith.constant 2 : i32
    %cst_33 = arith.constant 6.400000e+01 : f32
    %74 = vector.broadcast %cst_33 : f32 to vector<8x1xf32>
    %75 = arith.divf %57, %74 : vector<8x1xf32>
    %cst_34 = arith.constant 6.400000e+01 : f32
    %76 = vector.broadcast %cst_34 : f32 to vector<8x1xf32>
    %77 = arith.divf %65, %76 : vector<8x1xf32>
    %78 = arith.mulf %75, %75 : vector<8x1xf32>
    %79 = arith.subf %77, %78 : vector<8x1xf32>
    %cst_35 = arith.constant 0.000000e+00 : f32
    %80 = vector.broadcast %cst_35 : f32 to vector<8x1xf32>
    %81 = arith.maximumf %79, %80 : vector<8x1xf32>
    %c0_36 = arith.constant 0 : index
    %c0_37 = arith.constant 0 : index
    %82 = vector.load %arg3[%c0_36, %c0_37] : memref<8x1xf32, #tpu.memory_space<vmem>>, vector<8x1xf32>
    %cst_38 = arith.constant 9.99999974E-6 : f32
    %83 = vector.broadcast %cst_38 : f32 to vector<8x1xf32>
    %84 = arith.addf %81, %83 : vector<8x1xf32>
    %85 = math.rsqrt %84 : vector<8x1xf32>
    %86 = arith.mulf %82, %85 : vector<8x1xf32>
    %c0_39 = arith.constant 0 : index
    %c0_40 = arith.constant 0 : index
    %87 = vector.load %arg4[%c0_39, %c0_40] : memref<8x1xf32, #tpu.memory_space<vmem>>, vector<8x1xf32>
    %88 = arith.mulf %75, %86 : vector<8x1xf32>
    %89 = arith.subf %87, %88 : vector<8x1xf32>
    %90 = tpu.concatenate %86, %86 in 0 : vector<8x1xf32>, vector<8x1xf32> -> vector<16x1xf32>
    %91 = tpu.concatenate %89, %89 in 0 : vector<8x1xf32>, vector<8x1xf32> -> vector<16x1xf32>
    %c0_i32_41 = arith.constant 0 : i32
    %c2_i32_42 = arith.constant 2 : i32
    %92 = arith.muli %c2_i32_42, %c0_i32_41 : i32
    %c8_i32_43 = arith.constant 8 : i32
    %93 = arith.muli %92, %c8_i32_43 : i32
    %94 = tpu.assume_multiple %93, 16 : i32
    %c0_44 = arith.constant 0 : index
    %95 = arith.index_cast %94 : i32 to index
    %c0_45 = arith.constant 0 : index
    %96 = vector.load %arg5[%c0_44, %95, %c0_45] : memref<1x32x128xbf16, #tpu.memory_space<vmem>>, vector<1x16x128xbf16>
    %97 = vector.shape_cast %96 : vector<1x16x128xbf16> to vector<16x128xbf16>
    %98 = arith.extf %97 : vector<16x128xbf16> to vector<16x128xf32>
    %99 = vector.broadcast %90 : vector<16x1xf32> to vector<16x128xf32>
    %100 = arith.mulf %98, %99 : vector<16x128xf32>
    %101 = vector.broadcast %91 : vector<16x1xf32> to vector<16x128xf32>
    %102 = arith.addf %100, %101 : vector<16x128xf32>
    %cst_46 = arith.constant 0.000000e+00 : f32
    %103 = vector.broadcast %cst_46 : f32 to vector<16x128xf32>
    %104 = arith.cmpf oge, %102, %103 : vector<16x128xf32>
    %cst_47 = arith.constant 0.00999999977 : f32
    %105 = vector.broadcast %cst_47 : f32 to vector<16x128xf32>
    %106 = arith.mulf %105, %102 : vector<16x128xf32>
    %107 = arith.select %104, %102, %106 : vector<16x128xi1>, vector<16x128xf32>
    %108 = arith.truncf %107 : vector<16x128xf32> to vector<16x128xbf16>
    %c0_48 = arith.constant 0 : index
    %109 = arith.index_cast %94 : i32 to index
    %c0_49 = arith.constant 0 : index
    %110 = vector.load %arg5[%c0_48, %109, %c0_49] : memref<1x32x128xbf16, #tpu.memory_space<vmem>>, vector<1x16x128xbf16>
    %111 = vector.shape_cast %110 : vector<1x16x128xbf16> to vector<16x128xbf16>
    %112 = vector.shape_cast %108 : vector<16x128xbf16> to vector<1x16x128xbf16>
    tpu.vector_store %arg5[%c0_48, %109, %c0_49], %112 {strides = array<i32>} : memref<1x32x128xbf16, #tpu.memory_space<vmem>>, vector<1x16x128xbf16>,
    %c1_i32_50 = arith.constant 1 : i32
    %c2_i32_51 = arith.constant 2 : i32
    %113 = arith.muli %c2_i32_51, %c1_i32_50 : i32
    %c8_i32_52 = arith.constant 8 : i32
    %114 = arith.muli %113, %c8_i32_52 : i32
    %115 = tpu.assume_multiple %114, 16 : i32
    %c0_53 = arith.constant 0 : index
    %116 = arith.index_cast %115 : i32 to index
    %c0_54 = arith.constant 0 : index
    %117 = vector.load %arg5[%c0_53, %116, %c0_54] : memref<1x32x128xbf16, #tpu.memory_space<vmem>>, vector<1x16x128xbf16>
    %118 = vector.shape_cast %117 : vector<1x16x128xbf16> to vector<16x128xbf16>
    %119 = arith.extf %118 : vector<16x128xbf16> to vector<16x128xf32>
    %120 = vector.broadcast %90 : vector<16x1xf32> to vector<16x128xf32>
    %121 = arith.mulf %119, %120 : vector<16x128xf32>
    %122 = vector.broadcast %91 : vector<16x1xf32> to vector<16x128xf32>
    %123 = arith.addf %121, %122 : vector<16x128xf32>
    %cst_55 = arith.constant 0.000000e+00 : f32
    %124 = vector.broadcast %cst_55 : f32 to vector<16x128xf32>
    %125 = arith.cmpf oge, %123, %124 : vector<16x128xf32>
    %cst_56 = arith.constant 0.00999999977 : f32
    %126 = vector.broadcast %cst_56 : f32 to vector<16x128xf32>
    %127 = arith.mulf %126, %123 : vector<16x128xf32>
    %128 = arith.select %125, %123, %127 : vector<16x128xi1>, vector<16x128xf32>
    %129 = arith.truncf %128 : vector<16x128xf32> to vector<16x128xbf16>
    %c0_57 = arith.constant 0 : index
    %130 = arith.index_cast %115 : i32 to index
    %c0_58 = arith.constant 0 : index
    %131 = vector.load %arg5[%c0_57, %130, %c0_58] : memref<1x32x128xbf16, #tpu.memory_space<vmem>>, vector<1x16x128xbf16>
    %132 = vector.shape_cast %131 : vector<1x16x128xbf16> to vector<16x128xbf16>
    %133 = vector.shape_cast %129 : vector<16x128xbf16> to vector<1x16x128xbf16>
    tpu.vector_store %arg5[%c0_57, %130, %c0_58], %133 {strides = array<i32>} : memref<1x32x128xbf16, #tpu.memory_space<vmem>>, vector<1x16x128xbf16>,
    %c2_i32_59 = arith.constant 2 : i32
    return
  }
  func.func @transform_0(%arg0: i32) -> (i32, i32, i32) {
    %c0_i32 = arith.constant 0 : i32
    %c0_i32_0 = arith.constant 0 : i32
    %c0_i32_1 = arith.constant 0 : i32
    return %arg0, %c0_i32, %c0_i32_0 : i32, i32, i32
  }
  func.func @transform_1(%arg0: i32) -> (i32, i32) {
    %c0_i32 = arith.constant 0 : i32
    %c0_i32_0 = arith.constant 0 : i32
    %c0_i32_1 = arith.constant 0 : i32
    return %c0_i32, %c0_i32_0 : i32, i32
  }
  func.func @transform_2(%arg0: i32) -> (i32, i32) {
    %c0_i32 = arith.constant 0 : i32
    %c0_i32_0 = arith.constant 0 : i32
    %c0_i32_1 = arith.constant 0 : i32
    return %c0_i32, %c0_i32_0 : i32, i32
  }
  func.func @transform_3(%arg0: i32) -> (i32, i32) {
    %c0_i32 = arith.constant 0 : i32
    %c0_i32_0 = arith.constant 0 : i32
    %c0_i32_1 = arith.constant 0 : i32
    return %c0_i32, %c0_i32_0 : i32, i32
  }
  func.func @transform_4(%arg0: i32) -> (i32, i32, i32) {
    %c0_i32 = arith.constant 0 : i32
    %c0_i32_0 = arith.constant 0 : i32
    %c0_i32_1 = arith.constant 0 : i32
    return %arg0, %c0_i32, %c0_i32_0 : i32, i32, i32
  }
}

module attributes {stable_mosaic.version = 11 : i64} {
  func.func @_conv_in_lrelu_kernel(%arg0: i32, %arg1: memref<1x480x128xbf16, #tpu.memory_space<vmem>>, %arg2: memref<8x240xbf16, #tpu.memory_space<vmem>>, %arg3: memref<8x1xf32, #tpu.memory_space<vmem>>, %arg4: memref<8x1xf32, #tpu.memory_space<vmem>>, %arg5: memref<1x32x128xbf16, #tpu.memory_space<vmem>>, %arg6: memref<1x32x128xbf16, #tpu.memory_space<vmem>>) attributes {dimension_semantics = [#tpu.dimension_semantics<parallel>], iteration_bounds = array<i64: 2>, scalar_prefetch = 0 : i64, scratch_operands = 0 : i64, tpu.core_type = #tpu.core_type<tc>, window_params = [{transform_indices = @transform_0, window_bounds = array<i64: 1, 480, 128>}, {pipeline_mode = #tpu.pipeline_mode<synchronous>, transform_indices = @transform_1, window_bounds = array<i64: 8, 240>}, {pipeline_mode = #tpu.pipeline_mode<synchronous>, transform_indices = @transform_2, window_bounds = array<i64: 8, 1>}, {pipeline_mode = #tpu.pipeline_mode<synchronous>, transform_indices = @transform_3, window_bounds = array<i64: 8, 1>}, {transform_indices = @transform_4, window_bounds = array<i64: 1, 32, 128>}, {transform_indices = @transform_5, window_bounds = array<i64: 1, 32, 128>}]} {
    %c0 = arith.constant 0 : index
    %c0_0 = arith.constant 0 : index
    %0 = vector.load %arg2[%c0, %c0_0] : memref<8x240xbf16, #tpu.memory_space<vmem>>, vector<8x240xbf16>
    %cst = arith.constant 0.000000e+00 : f32
    %1 = vector.broadcast %cst : f32 to vector<8x1xf32>
    %c0_i32 = arith.constant 0 : i32
    %c2_i32 = arith.constant 2 : i32
    %2 = arith.muli %c2_i32, %c0_i32 : i32
    %c80_i32 = arith.constant 80 : i32
    %3 = arith.muli %2, %c80_i32 : i32
    %4 = tpu.assume_multiple %3, 80 : i32
    %c0_1 = arith.constant 0 : index
    %5 = arith.index_cast %4 : i32 to index
    %c0_2 = arith.constant 0 : index
    %6 = vector.load %arg1[%c0_1, %5, %c0_2] : memref<1x480x128xbf16, #tpu.memory_space<vmem>>, vector<1x240x128xbf16>
    %7 = vector.shape_cast %6 : vector<1x240x128xbf16> to vector<240x128xbf16>
    %cst_3 = arith.constant dense<0.000000e+00> : vector<8x128xf32>
    %8 = tpu.matmul %0, %7, %cst_3 {dimension_numbers = #tpu.dot_dimension_numbers<[1], [0], [0], [1], [0, 0, 1, 1], [], []>} : vector<8x240xbf16>, vector<240x128xbf16>, vector<8x128xf32> -> vector<8x128xf32>
    %c1_i32 = arith.constant 1 : i32
    %9 = arith.addi %2, %c1_i32 : i32
    %c80_i32_4 = arith.constant 80 : i32
    %10 = arith.muli %9, %c80_i32_4 : i32
    %11 = tpu.assume_multiple %10, 80 : i32
    %c0_5 = arith.constant 0 : index
    %12 = arith.index_cast %11 : i32 to index
    %c0_6 = arith.constant 0 : index
    %13 = vector.load %arg1[%c0_5, %12, %c0_6] : memref<1x480x128xbf16, #tpu.memory_space<vmem>>, vector<1x240x128xbf16>
    %14 = vector.shape_cast %13 : vector<1x240x128xbf16> to vector<240x128xbf16>
    %cst_7 = arith.constant dense<0.000000e+00> : vector<8x128xf32>
    %15 = tpu.matmul %0, %14, %cst_7 {dimension_numbers = #tpu.dot_dimension_numbers<[1], [0], [0], [1], [0, 0, 1, 1], [], []>} : vector<8x240xbf16>, vector<240x128xbf16>, vector<8x128xf32> -> vector<8x128xf32>
    %cst_8 = arith.constant dense<0.000000e+00> : vector<8xf32>
    %16 = vector.multi_reduction <add>, %8, %cst_8 [1] : vector<8x128xf32> to vector<8xf32>
    %17 = vector.shape_cast %16 : vector<8xf32> to vector<8x1xf32>
    %18 = arith.addf %1, %17 : vector<8x1xf32>
    %cst_9 = arith.constant dense<0.000000e+00> : vector<8xf32>
    %19 = vector.multi_reduction <add>, %15, %cst_9 [1] : vector<8x128xf32> to vector<8xf32>
    %20 = vector.shape_cast %19 : vector<8xf32> to vector<8x1xf32>
    %21 = arith.addf %18, %20 : vector<8x1xf32>
    %22 = arith.mulf %8, %8 : vector<8x128xf32>
    %cst_10 = arith.constant dense<0.000000e+00> : vector<8xf32>
    %23 = vector.multi_reduction <add>, %22, %cst_10 [1] : vector<8x128xf32> to vector<8xf32>
    %24 = vector.shape_cast %23 : vector<8xf32> to vector<8x1xf32>
    %25 = arith.addf %1, %24 : vector<8x1xf32>
    %26 = arith.mulf %15, %15 : vector<8x128xf32>
    %cst_11 = arith.constant dense<0.000000e+00> : vector<8xf32>
    %27 = vector.multi_reduction <add>, %26, %cst_11 [1] : vector<8x128xf32> to vector<8xf32>
    %28 = vector.shape_cast %27 : vector<8xf32> to vector<8x1xf32>
    %29 = arith.addf %25, %28 : vector<8x1xf32>
    %c8_i32 = arith.constant 8 : i32
    %30 = arith.muli %2, %c8_i32 : i32
    %31 = tpu.assume_multiple %30, 16 : i32
    %32 = tpu.concatenate %8, %15 in 0 : vector<8x128xf32>, vector<8x128xf32> -> vector<16x128xf32>
    %33 = arith.truncf %32 : vector<16x128xf32> to vector<16x128xbf16>
    %c0_12 = arith.constant 0 : index
    %34 = arith.index_cast %31 : i32 to index
    %c0_13 = arith.constant 0 : index
    %35 = vector.load %arg6[%c0_12, %34, %c0_13] : memref<1x32x128xbf16, #tpu.memory_space<vmem>>, vector<1x16x128xbf16>
    %36 = vector.shape_cast %35 : vector<1x16x128xbf16> to vector<16x128xbf16>
    %37 = vector.shape_cast %33 : vector<16x128xbf16> to vector<1x16x128xbf16>
    tpu.vector_store %arg6[%c0_12, %34, %c0_13], %37 {strides = array<i32>} : memref<1x32x128xbf16, #tpu.memory_space<vmem>>, vector<1x16x128xbf16>,
    %c1_i32_14 = arith.constant 1 : i32
    %c2_i32_15 = arith.constant 2 : i32
    %38 = arith.muli %c2_i32_15, %c1_i32_14 : i32
    %c80_i32_16 = arith.constant 80 : i32
    %39 = arith.muli %38, %c80_i32_16 : i32
    %40 = tpu.assume_multiple %39, 80 : i32
    %c0_17 = arith.constant 0 : index
    %41 = arith.index_cast %40 : i32 to index
    %c0_18 = arith.constant 0 : index
    %42 = vector.load %arg1[%c0_17, %41, %c0_18] : memref<1x480x128xbf16, #tpu.memory_space<vmem>>, vector<1x240x128xbf16>
    %43 = vector.shape_cast %42 : vector<1x240x128xbf16> to vector<240x128xbf16>
    %cst_19 = arith.constant dense<0.000000e+00> : vector<8x128xf32>
    %44 = tpu.matmul %0, %43, %cst_19 {dimension_numbers = #tpu.dot_dimension_numbers<[1], [0], [0], [1], [0, 0, 1, 1], [], []>} : vector<8x240xbf16>, vector<240x128xbf16>, vector<8x128xf32> -> vector<8x128xf32>
    %c1_i32_20 = arith.constant 1 : i32
    %45 = arith.addi %38, %c1_i32_20 : i32
    %c80_i32_21 = arith.constant 80 : i32
    %46 = arith.muli %45, %c80_i32_21 : i32
    %47 = tpu.assume_multiple %46, 80 : i32
    %c0_22 = arith.constant 0 : index
    %48 = arith.index_cast %47 : i32 to index
    %c0_23 = arith.constant 0 : index
    %49 = vector.load %arg1[%c0_22, %48, %c0_23] : memref<1x480x128xbf16, #tpu.memory_space<vmem>>, vector<1x240x128xbf16>
    %50 = vector.shape_cast %49 : vector<1x240x128xbf16> to vector<240x128xbf16>
    %cst_24 = arith.constant dense<0.000000e+00> : vector<8x128xf32>
    %51 = tpu.matmul %0, %50, %cst_24 {dimension_numbers = #tpu.dot_dimension_numbers<[1], [0], [0], [1], [0, 0, 1, 1], [], []>} : vector<8x240xbf16>, vector<240x128xbf16>, vector<8x128xf32> -> vector<8x128xf32>
    %cst_25 = arith.constant dense<0.000000e+00> : vector<8xf32>
    %52 = vector.multi_reduction <add>, %44, %cst_25 [1] : vector<8x128xf32> to vector<8xf32>
    %53 = vector.shape_cast %52 : vector<8xf32> to vector<8x1xf32>
    %54 = arith.addf %21, %53 : vector<8x1xf32>
    %cst_26 = arith.constant dense<0.000000e+00> : vector<8xf32>
    %55 = vector.multi_reduction <add>, %51, %cst_26 [1] : vector<8x128xf32> to vector<8xf32>
    %56 = vector.shape_cast %55 : vector<8xf32> to vector<8x1xf32>
    %57 = arith.addf %54, %56 : vector<8x1xf32>
    %58 = arith.mulf %44, %44 : vector<8x128xf32>
    %cst_27 = arith.constant dense<0.000000e+00> : vector<8xf32>
    %59 = vector.multi_reduction <add>, %58, %cst_27 [1] : vector<8x128xf32> to vector<8xf32>
    %60 = vector.shape_cast %59 : vector<8xf32> to vector<8x1xf32>
    %61 = arith.addf %29, %60 : vector<8x1xf32>
    %62 = arith.mulf %51, %51 : vector<8x128xf32>
    %cst_28 = arith.constant dense<0.000000e+00> : vector<8xf32>
    %63 = vector.multi_reduction <add>, %62, %cst_28 [1] : vector<8x128xf32> to vector<8xf32>
    %64 = vector.shape_cast %63 : vector<8xf32> to vector<8x1xf32>
    %65 = arith.addf %61, %64 : vector<8x1xf32>
    %c8_i32_29 = arith.constant 8 : i32
    %66 = arith.muli %38, %c8_i32_29 : i32
    %67 = tpu.assume_multiple %66, 16 : i32
    %68 = tpu.concatenate %44, %51 in 0 : vector<8x128xf32>, vector<8x128xf32> -> vector<16x128xf32>
    %69 = arith.truncf %68 : vector<16x128xf32> to vector<16x128xbf16>
    %c0_30 = arith.constant 0 : index
    %70 = arith.index_cast %67 : i32 to index
    %c0_31 = arith.constant 0 : index
    %71 = vector.load %arg6[%c0_30, %70, %c0_31] : memref<1x32x128xbf16, #tpu.memory_space<vmem>>, vector<1x16x128xbf16>
    %72 = vector.shape_cast %71 : vector<1x16x128xbf16> to vector<16x128xbf16>
    %73 = vector.shape_cast %69 : vector<16x128xbf16> to vector<1x16x128xbf16>
    tpu.vector_store %arg6[%c0_30, %70, %c0_31], %73 {strides = array<i32>} : memref<1x32x128xbf16, #tpu.memory_space<vmem>>, vector<1x16x128xbf16>,
    %c2_i32_32 = arith.constant 2 : i32
    %cst_33 = arith.constant 6.400000e+01 : f32
    %74 = vector.broadcast %cst_33 : f32 to vector<8x1xf32>
    %75 = arith.divf %57, %74 : vector<8x1xf32>
    %cst_34 = arith.constant 6.400000e+01 : f32
    %76 = vector.broadcast %cst_34 : f32 to vector<8x1xf32>
    %77 = arith.divf %65, %76 : vector<8x1xf32>
    %78 = arith.mulf %75, %75 : vector<8x1xf32>
    %79 = arith.subf %77, %78 : vector<8x1xf32>
    %cst_35 = arith.constant 0.000000e+00 : f32
    %80 = vector.broadcast %cst_35 : f32 to vector<8x1xf32>
    %81 = arith.maximumf %79, %80 : vector<8x1xf32>
    %c0_36 = arith.constant 0 : index
    %c0_37 = arith.constant 0 : index
    %82 = vector.load %arg3[%c0_36, %c0_37] : memref<8x1xf32, #tpu.memory_space<vmem>>, vector<8x1xf32>
    %cst_38 = arith.constant 9.99999974E-6 : f32
    %83 = vector.broadcast %cst_38 : f32 to vector<8x1xf32>
    %84 = arith.addf %81, %83 : vector<8x1xf32>
    %85 = math.rsqrt %84 : vector<8x1xf32>
    %86 = arith.mulf %82, %85 : vector<8x1xf32>
    %c0_39 = arith.constant 0 : index
    %c0_40 = arith.constant 0 : index
    %87 = vector.load %arg4[%c0_39, %c0_40] : memref<8x1xf32, #tpu.memory_space<vmem>>, vector<8x1xf32>
    %88 = arith.mulf %75, %86 : vector<8x1xf32>
    %89 = arith.subf %87, %88 : vector<8x1xf32>
    %90 = tpu.concatenate %86, %86 in 0 : vector<8x1xf32>, vector<8x1xf32> -> vector<16x1xf32>
    %91 = tpu.concatenate %89, %89 in 0 : vector<8x1xf32>, vector<8x1xf32> -> vector<16x1xf32>
    %c0_i32_41 = arith.constant 0 : i32
    %c2_i32_42 = arith.constant 2 : i32
    %92 = arith.muli %c2_i32_42, %c0_i32_41 : i32
    %c8_i32_43 = arith.constant 8 : i32
    %93 = arith.muli %92, %c8_i32_43 : i32
    %94 = tpu.assume_multiple %93, 16 : i32
    %c0_44 = arith.constant 0 : index
    %95 = arith.index_cast %94 : i32 to index
    %c0_45 = arith.constant 0 : index
    %96 = vector.load %arg6[%c0_44, %95, %c0_45] : memref<1x32x128xbf16, #tpu.memory_space<vmem>>, vector<1x16x128xbf16>
    %97 = vector.shape_cast %96 : vector<1x16x128xbf16> to vector<16x128xbf16>
    %98 = arith.extf %97 : vector<16x128xbf16> to vector<16x128xf32>
    %99 = vector.broadcast %90 : vector<16x1xf32> to vector<16x128xf32>
    %100 = arith.mulf %98, %99 : vector<16x128xf32>
    %101 = vector.broadcast %91 : vector<16x1xf32> to vector<16x128xf32>
    %102 = arith.addf %100, %101 : vector<16x128xf32>
    %c0_46 = arith.constant 0 : index
    %103 = arith.index_cast %94 : i32 to index
    %c0_47 = arith.constant 0 : index
    %104 = vector.load %arg5[%c0_46, %103, %c0_47] : memref<1x32x128xbf16, #tpu.memory_space<vmem>>, vector<1x16x128xbf16>
    %105 = vector.shape_cast %104 : vector<1x16x128xbf16> to vector<16x128xbf16>
    %106 = arith.extf %105 : vector<16x128xbf16> to vector<16x128xf32>
    %107 = arith.addf %102, %106 : vector<16x128xf32>
    %cst_48 = arith.constant 0.000000e+00 : f32
    %108 = vector.broadcast %cst_48 : f32 to vector<16x128xf32>
    %109 = arith.cmpf oge, %107, %108 : vector<16x128xf32>
    %cst_49 = arith.constant 0.00999999977 : f32
    %110 = vector.broadcast %cst_49 : f32 to vector<16x128xf32>
    %111 = arith.mulf %110, %107 : vector<16x128xf32>
    %112 = arith.select %109, %107, %111 : vector<16x128xi1>, vector<16x128xf32>
    %113 = arith.truncf %112 : vector<16x128xf32> to vector<16x128xbf16>
    %c0_50 = arith.constant 0 : index
    %114 = arith.index_cast %94 : i32 to index
    %c0_51 = arith.constant 0 : index
    %115 = vector.load %arg6[%c0_50, %114, %c0_51] : memref<1x32x128xbf16, #tpu.memory_space<vmem>>, vector<1x16x128xbf16>
    %116 = vector.shape_cast %115 : vector<1x16x128xbf16> to vector<16x128xbf16>
    %117 = vector.shape_cast %113 : vector<16x128xbf16> to vector<1x16x128xbf16>
    tpu.vector_store %arg6[%c0_50, %114, %c0_51], %117 {strides = array<i32>} : memref<1x32x128xbf16, #tpu.memory_space<vmem>>, vector<1x16x128xbf16>,
    %c1_i32_52 = arith.constant 1 : i32
    %c2_i32_53 = arith.constant 2 : i32
    %118 = arith.muli %c2_i32_53, %c1_i32_52 : i32
    %c8_i32_54 = arith.constant 8 : i32
    %119 = arith.muli %118, %c8_i32_54 : i32
    %120 = tpu.assume_multiple %119, 16 : i32
    %c0_55 = arith.constant 0 : index
    %121 = arith.index_cast %120 : i32 to index
    %c0_56 = arith.constant 0 : index
    %122 = vector.load %arg6[%c0_55, %121, %c0_56] : memref<1x32x128xbf16, #tpu.memory_space<vmem>>, vector<1x16x128xbf16>
    %123 = vector.shape_cast %122 : vector<1x16x128xbf16> to vector<16x128xbf16>
    %124 = arith.extf %123 : vector<16x128xbf16> to vector<16x128xf32>
    %125 = vector.broadcast %90 : vector<16x1xf32> to vector<16x128xf32>
    %126 = arith.mulf %124, %125 : vector<16x128xf32>
    %127 = vector.broadcast %91 : vector<16x1xf32> to vector<16x128xf32>
    %128 = arith.addf %126, %127 : vector<16x128xf32>
    %c0_57 = arith.constant 0 : index
    %129 = arith.index_cast %120 : i32 to index
    %c0_58 = arith.constant 0 : index
    %130 = vector.load %arg5[%c0_57, %129, %c0_58] : memref<1x32x128xbf16, #tpu.memory_space<vmem>>, vector<1x16x128xbf16>
    %131 = vector.shape_cast %130 : vector<1x16x128xbf16> to vector<16x128xbf16>
    %132 = arith.extf %131 : vector<16x128xbf16> to vector<16x128xf32>
    %133 = arith.addf %128, %132 : vector<16x128xf32>
    %cst_59 = arith.constant 0.000000e+00 : f32
    %134 = vector.broadcast %cst_59 : f32 to vector<16x128xf32>
    %135 = arith.cmpf oge, %133, %134 : vector<16x128xf32>
    %cst_60 = arith.constant 0.00999999977 : f32
    %136 = vector.broadcast %cst_60 : f32 to vector<16x128xf32>
    %137 = arith.mulf %136, %133 : vector<16x128xf32>
    %138 = arith.select %135, %133, %137 : vector<16x128xi1>, vector<16x128xf32>
    %139 = arith.truncf %138 : vector<16x128xf32> to vector<16x128xbf16>
    %c0_61 = arith.constant 0 : index
    %140 = arith.index_cast %120 : i32 to index
    %c0_62 = arith.constant 0 : index
    %141 = vector.load %arg6[%c0_61, %140, %c0_62] : memref<1x32x128xbf16, #tpu.memory_space<vmem>>, vector<1x16x128xbf16>
    %142 = vector.shape_cast %141 : vector<1x16x128xbf16> to vector<16x128xbf16>
    %143 = vector.shape_cast %139 : vector<16x128xbf16> to vector<1x16x128xbf16>
    tpu.vector_store %arg6[%c0_61, %140, %c0_62], %143 {strides = array<i32>} : memref<1x32x128xbf16, #tpu.memory_space<vmem>>, vector<1x16x128xbf16>,
    %c2_i32_63 = arith.constant 2 : i32
    return
  }
  func.func @transform_0(%arg0: i32) -> (i32, i32, i32) {
    %c0_i32 = arith.constant 0 : i32
    %c0_i32_0 = arith.constant 0 : i32
    %c0_i32_1 = arith.constant 0 : i32
    return %arg0, %c0_i32, %c0_i32_0 : i32, i32, i32
  }
  func.func @transform_1(%arg0: i32) -> (i32, i32) {
    %c0_i32 = arith.constant 0 : i32
    %c0_i32_0 = arith.constant 0 : i32
    %c0_i32_1 = arith.constant 0 : i32
    return %c0_i32, %c0_i32_0 : i32, i32
  }
  func.func @transform_2(%arg0: i32) -> (i32, i32) {
    %c0_i32 = arith.constant 0 : i32
    %c0_i32_0 = arith.constant 0 : i32
    %c0_i32_1 = arith.constant 0 : i32
    return %c0_i32, %c0_i32_0 : i32, i32
  }
  func.func @transform_3(%arg0: i32) -> (i32, i32) {
    %c0_i32 = arith.constant 0 : i32
    %c0_i32_0 = arith.constant 0 : i32
    %c0_i32_1 = arith.constant 0 : i32
    return %c0_i32, %c0_i32_0 : i32, i32
  }
  func.func @transform_4(%arg0: i32) -> (i32, i32, i32) {
    %c0_i32 = arith.constant 0 : i32
    %c0_i32_0 = arith.constant 0 : i32
    %c0_i32_1 = arith.constant 0 : i32
    return %arg0, %c0_i32, %c0_i32_0 : i32, i32, i32
  }
  func.func @transform_5(%arg0: i32) -> (i32, i32, i32) {
    %c0_i32 = arith.constant 0 : i32
    %c0_i32_0 = arith.constant 0 : i32
    %c0_i32_1 = arith.constant 0 : i32
    return %arg0, %c0_i32, %c0_i32_0 : i32, i32, i32
  }
}

module attributes {stable_mosaic.version = 11 : i64} {
  func.func @_conv_in_lrelu_kernel(%arg0: i32, %arg1: memref<1x480x128xbf16, #tpu.memory_space<vmem>>, %arg2: memref<8x240xbf16, #tpu.memory_space<vmem>>, %arg3: memref<8x1xf32, #tpu.memory_space<vmem>>, %arg4: memref<8x1xf32, #tpu.memory_space<vmem>>, %arg5: memref<1x32x128xbf16, #tpu.memory_space<vmem>>) attributes {dimension_semantics = [#tpu.dimension_semantics<parallel>], iteration_bounds = array<i64: 2>, scalar_prefetch = 0 : i64, scratch_operands = 0 : i64, tpu.core_type = #tpu.core_type<tc>, window_params = [{transform_indices = @transform_0, window_bounds = array<i64: 1, 480, 128>}, {pipeline_mode = #tpu.pipeline_mode<synchronous>, transform_indices = @transform_1, window_bounds = array<i64: 8, 240>}, {pipeline_mode = #tpu.pipeline_mode<synchronous>, transform_indices = @transform_2, window_bounds = array<i64: 8, 1>}, {pipeline_mode = #tpu.pipeline_mode<synchronous>, transform_indices = @transform_3, window_bounds = array<i64: 8, 1>}, {transform_indices = @transform_4, window_bounds = array<i64: 1, 32, 128>}]} {
    %c0 = arith.constant 0 : index
    %c0_0 = arith.constant 0 : index
    %0 = vector.load %arg2[%c0, %c0_0] : memref<8x240xbf16, #tpu.memory_space<vmem>>, vector<8x240xbf16>
    %cst = arith.constant 0.000000e+00 : f32
    %1 = vector.broadcast %cst : f32 to vector<8x1xf32>
    %c0_i32 = arith.constant 0 : i32
    %c2_i32 = arith.constant 2 : i32
    %2 = arith.muli %c2_i32, %c0_i32 : i32
    %c80_i32 = arith.constant 80 : i32
    %3 = arith.muli %2, %c80_i32 : i32
    %4 = tpu.assume_multiple %3, 80 : i32
    %c0_1 = arith.constant 0 : index
    %5 = arith.index_cast %4 : i32 to index
    %c0_2 = arith.constant 0 : index
    %6 = vector.load %arg1[%c0_1, %5, %c0_2] : memref<1x480x128xbf16, #tpu.memory_space<vmem>>, vector<1x240x128xbf16>
    %7 = vector.shape_cast %6 : vector<1x240x128xbf16> to vector<240x128xbf16>
    %cst_3 = arith.constant dense<0.000000e+00> : vector<8x128xf32>
    %8 = tpu.matmul %0, %7, %cst_3 {dimension_numbers = #tpu.dot_dimension_numbers<[1], [0], [0], [1], [0, 0, 1, 1], [], []>} : vector<8x240xbf16>, vector<240x128xbf16>, vector<8x128xf32> -> vector<8x128xf32>
    %c1_i32 = arith.constant 1 : i32
    %9 = arith.addi %2, %c1_i32 : i32
    %c80_i32_4 = arith.constant 80 : i32
    %10 = arith.muli %9, %c80_i32_4 : i32
    %11 = tpu.assume_multiple %10, 80 : i32
    %c0_5 = arith.constant 0 : index
    %12 = arith.index_cast %11 : i32 to index
    %c0_6 = arith.constant 0 : index
    %13 = vector.load %arg1[%c0_5, %12, %c0_6] : memref<1x480x128xbf16, #tpu.memory_space<vmem>>, vector<1x240x128xbf16>
    %14 = vector.shape_cast %13 : vector<1x240x128xbf16> to vector<240x128xbf16>
    %cst_7 = arith.constant dense<0.000000e+00> : vector<8x128xf32>
    %15 = tpu.matmul %0, %14, %cst_7 {dimension_numbers = #tpu.dot_dimension_numbers<[1], [0], [0], [1], [0, 0, 1, 1], [], []>} : vector<8x240xbf16>, vector<240x128xbf16>, vector<8x128xf32> -> vector<8x128xf32>
    %cst_8 = arith.constant dense<0.000000e+00> : vector<8xf32>
    %16 = vector.multi_reduction <add>, %8, %cst_8 [1] : vector<8x128xf32> to vector<8xf32>
    %17 = vector.shape_cast %16 : vector<8xf32> to vector<8x1xf32>
    %18 = arith.addf %1, %17 : vector<8x1xf32>
    %cst_9 = arith.constant dense<0.000000e+00> : vector<8xf32>
    %19 = vector.multi_reduction <add>, %15, %cst_9 [1] : vector<8x128xf32> to vector<8xf32>
    %20 = vector.shape_cast %19 : vector<8xf32> to vector<8x1xf32>
    %21 = arith.addf %18, %20 : vector<8x1xf32>
    %22 = arith.mulf %8, %8 : vector<8x128xf32>
    %cst_10 = arith.constant dense<0.000000e+00> : vector<8xf32>
    %23 = vector.multi_reduction <add>, %22, %cst_10 [1] : vector<8x128xf32> to vector<8xf32>
    %24 = vector.shape_cast %23 : vector<8xf32> to vector<8x1xf32>
    %25 = arith.addf %1, %24 : vector<8x1xf32>
    %26 = arith.mulf %15, %15 : vector<8x128xf32>
    %cst_11 = arith.constant dense<0.000000e+00> : vector<8xf32>
    %27 = vector.multi_reduction <add>, %26, %cst_11 [1] : vector<8x128xf32> to vector<8xf32>
    %28 = vector.shape_cast %27 : vector<8xf32> to vector<8x1xf32>
    %29 = arith.addf %25, %28 : vector<8x1xf32>
    %c8_i32 = arith.constant 8 : i32
    %30 = arith.muli %2, %c8_i32 : i32
    %31 = tpu.assume_multiple %30, 16 : i32
    %32 = tpu.concatenate %8, %15 in 0 : vector<8x128xf32>, vector<8x128xf32> -> vector<16x128xf32>
    %33 = arith.truncf %32 : vector<16x128xf32> to vector<16x128xbf16>
    %c0_12 = arith.constant 0 : index
    %34 = arith.index_cast %31 : i32 to index
    %c0_13 = arith.constant 0 : index
    %35 = vector.load %arg5[%c0_12, %34, %c0_13] : memref<1x32x128xbf16, #tpu.memory_space<vmem>>, vector<1x16x128xbf16>
    %36 = vector.shape_cast %35 : vector<1x16x128xbf16> to vector<16x128xbf16>
    %37 = vector.shape_cast %33 : vector<16x128xbf16> to vector<1x16x128xbf16>
    tpu.vector_store %arg5[%c0_12, %34, %c0_13], %37 {strides = array<i32>} : memref<1x32x128xbf16, #tpu.memory_space<vmem>>, vector<1x16x128xbf16>,
    %c1_i32_14 = arith.constant 1 : i32
    %c2_i32_15 = arith.constant 2 : i32
    %38 = arith.muli %c2_i32_15, %c1_i32_14 : i32
    %c80_i32_16 = arith.constant 80 : i32
    %39 = arith.muli %38, %c80_i32_16 : i32
    %40 = tpu.assume_multiple %39, 80 : i32
    %c0_17 = arith.constant 0 : index
    %41 = arith.index_cast %40 : i32 to index
    %c0_18 = arith.constant 0 : index
    %42 = vector.load %arg1[%c0_17, %41, %c0_18] : memref<1x480x128xbf16, #tpu.memory_space<vmem>>, vector<1x240x128xbf16>
    %43 = vector.shape_cast %42 : vector<1x240x128xbf16> to vector<240x128xbf16>
    %cst_19 = arith.constant dense<0.000000e+00> : vector<8x128xf32>
    %44 = tpu.matmul %0, %43, %cst_19 {dimension_numbers = #tpu.dot_dimension_numbers<[1], [0], [0], [1], [0, 0, 1, 1], [], []>} : vector<8x240xbf16>, vector<240x128xbf16>, vector<8x128xf32> -> vector<8x128xf32>
    %c1_i32_20 = arith.constant 1 : i32
    %45 = arith.addi %38, %c1_i32_20 : i32
    %c80_i32_21 = arith.constant 80 : i32
    %46 = arith.muli %45, %c80_i32_21 : i32
    %47 = tpu.assume_multiple %46, 80 : i32
    %c0_22 = arith.constant 0 : index
    %48 = arith.index_cast %47 : i32 to index
    %c0_23 = arith.constant 0 : index
    %49 = vector.load %arg1[%c0_22, %48, %c0_23] : memref<1x480x128xbf16, #tpu.memory_space<vmem>>, vector<1x240x128xbf16>
    %50 = vector.shape_cast %49 : vector<1x240x128xbf16> to vector<240x128xbf16>
    %cst_24 = arith.constant dense<0.000000e+00> : vector<8x128xf32>
    %51 = tpu.matmul %0, %50, %cst_24 {dimension_numbers = #tpu.dot_dimension_numbers<[1], [0], [0], [1], [0, 0, 1, 1], [], []>} : vector<8x240xbf16>, vector<240x128xbf16>, vector<8x128xf32> -> vector<8x128xf32>
    %cst_25 = arith.constant dense<0.000000e+00> : vector<8xf32>
    %52 = vector.multi_reduction <add>, %44, %cst_25 [1] : vector<8x128xf32> to vector<8xf32>
    %53 = vector.shape_cast %52 : vector<8xf32> to vector<8x1xf32>
    %54 = arith.addf %21, %53 : vector<8x1xf32>
    %cst_26 = arith.constant dense<0.000000e+00> : vector<8xf32>
    %55 = vector.multi_reduction <add>, %51, %cst_26 [1] : vector<8x128xf32> to vector<8xf32>
    %56 = vector.shape_cast %55 : vector<8xf32> to vector<8x1xf32>
    %57 = arith.addf %54, %56 : vector<8x1xf32>
    %58 = arith.mulf %44, %44 : vector<8x128xf32>
    %cst_27 = arith.constant dense<0.000000e+00> : vector<8xf32>
    %59 = vector.multi_reduction <add>, %58, %cst_27 [1] : vector<8x128xf32> to vector<8xf32>
    %60 = vector.shape_cast %59 : vector<8xf32> to vector<8x1xf32>
    %61 = arith.addf %29, %60 : vector<8x1xf32>
    %62 = arith.mulf %51, %51 : vector<8x128xf32>
    %cst_28 = arith.constant dense<0.000000e+00> : vector<8xf32>
    %63 = vector.multi_reduction <add>, %62, %cst_28 [1] : vector<8x128xf32> to vector<8xf32>
    %64 = vector.shape_cast %63 : vector<8xf32> to vector<8x1xf32>
    %65 = arith.addf %61, %64 : vector<8x1xf32>
    %c8_i32_29 = arith.constant 8 : i32
    %66 = arith.muli %38, %c8_i32_29 : i32
    %67 = tpu.assume_multiple %66, 16 : i32
    %68 = tpu.concatenate %44, %51 in 0 : vector<8x128xf32>, vector<8x128xf32> -> vector<16x128xf32>
    %69 = arith.truncf %68 : vector<16x128xf32> to vector<16x128xbf16>
    %c0_30 = arith.constant 0 : index
    %70 = arith.index_cast %67 : i32 to index
    %c0_31 = arith.constant 0 : index
    %71 = vector.load %arg5[%c0_30, %70, %c0_31] : memref<1x32x128xbf16, #tpu.memory_space<vmem>>, vector<1x16x128xbf16>
    %72 = vector.shape_cast %71 : vector<1x16x128xbf16> to vector<16x128xbf16>
    %73 = vector.shape_cast %69 : vector<16x128xbf16> to vector<1x16x128xbf16>
    tpu.vector_store %arg5[%c0_30, %70, %c0_31], %73 {strides = array<i32>} : memref<1x32x128xbf16, #tpu.memory_space<vmem>>, vector<1x16x128xbf16>,
    %c2_i32_32 = arith.constant 2 : i32
    %cst_33 = arith.constant 6.400000e+01 : f32
    %74 = vector.broadcast %cst_33 : f32 to vector<8x1xf32>
    %75 = arith.divf %57, %74 : vector<8x1xf32>
    %cst_34 = arith.constant 6.400000e+01 : f32
    %76 = vector.broadcast %cst_34 : f32 to vector<8x1xf32>
    %77 = arith.divf %65, %76 : vector<8x1xf32>
    %78 = arith.mulf %75, %75 : vector<8x1xf32>
    %79 = arith.subf %77, %78 : vector<8x1xf32>
    %cst_35 = arith.constant 0.000000e+00 : f32
    %80 = vector.broadcast %cst_35 : f32 to vector<8x1xf32>
    %81 = arith.maximumf %79, %80 : vector<8x1xf32>
    %c0_36 = arith.constant 0 : index
    %c0_37 = arith.constant 0 : index
    %82 = vector.load %arg3[%c0_36, %c0_37] : memref<8x1xf32, #tpu.memory_space<vmem>>, vector<8x1xf32>
    %cst_38 = arith.constant 9.99999974E-6 : f32
    %83 = vector.broadcast %cst_38 : f32 to vector<8x1xf32>
    %84 = arith.addf %81, %83 : vector<8x1xf32>
    %85 = math.rsqrt %84 : vector<8x1xf32>
    %86 = arith.mulf %82, %85 : vector<8x1xf32>
    %c0_39 = arith.constant 0 : index
    %c0_40 = arith.constant 0 : index
    %87 = vector.load %arg4[%c0_39, %c0_40] : memref<8x1xf32, #tpu.memory_space<vmem>>, vector<8x1xf32>
    %88 = arith.mulf %75, %86 : vector<8x1xf32>
    %89 = arith.subf %87, %88 : vector<8x1xf32>
    %90 = tpu.concatenate %86, %86 in 0 : vector<8x1xf32>, vector<8x1xf32> -> vector<16x1xf32>
    %91 = tpu.concatenate %89, %89 in 0 : vector<8x1xf32>, vector<8x1xf32> -> vector<16x1xf32>
    %c0_i32_41 = arith.constant 0 : i32
    %c2_i32_42 = arith.constant 2 : i32
    %92 = arith.muli %c2_i32_42, %c0_i32_41 : i32
    %c8_i32_43 = arith.constant 8 : i32
    %93 = arith.muli %92, %c8_i32_43 : i32
    %94 = tpu.assume_multiple %93, 16 : i32
    %c0_44 = arith.constant 0 : index
    %95 = arith.index_cast %94 : i32 to index
    %c0_45 = arith.constant 0 : index
    %96 = vector.load %arg5[%c0_44, %95, %c0_45] : memref<1x32x128xbf16, #tpu.memory_space<vmem>>, vector<1x16x128xbf16>
    %97 = vector.shape_cast %96 : vector<1x16x128xbf16> to vector<16x128xbf16>
    %98 = arith.extf %97 : vector<16x128xbf16> to vector<16x128xf32>
    %99 = vector.broadcast %90 : vector<16x1xf32> to vector<16x128xf32>
    %100 = arith.mulf %98, %99 : vector<16x128xf32>
    %101 = vector.broadcast %91 : vector<16x1xf32> to vector<16x128xf32>
    %102 = arith.addf %100, %101 : vector<16x128xf32>
    %cst_46 = arith.constant 0.000000e+00 : f32
    %103 = vector.broadcast %cst_46 : f32 to vector<16x128xf32>
    %104 = arith.cmpf oge, %102, %103 : vector<16x128xf32>
    %cst_47 = arith.constant 0.00999999977 : f32
    %105 = vector.broadcast %cst_47 : f32 to vector<16x128xf32>
    %106 = arith.mulf %105, %102 : vector<16x128xf32>
    %107 = arith.select %104, %102, %106 : vector<16x128xi1>, vector<16x128xf32>
    %108 = arith.truncf %107 : vector<16x128xf32> to vector<16x128xbf16>
    %c0_48 = arith.constant 0 : index
    %109 = arith.index_cast %94 : i32 to index
    %c0_49 = arith.constant 0 : index
    %110 = vector.load %arg5[%c0_48, %109, %c0_49] : memref<1x32x128xbf16, #tpu.memory_space<vmem>>, vector<1x16x128xbf16>
    %111 = vector.shape_cast %110 : vector<1x16x128xbf16> to vector<16x128xbf16>
    %112 = vector.shape_cast %108 : vector<16x128xbf16> to vector<1x16x128xbf16>
    tpu.vector_store %arg5[%c0_48, %109, %c0_49], %112 {strides = array<i32>} : memref<1x32x128xbf16, #tpu.memory_space<vmem>>, vector<1x16x128xbf16>,
    %c1_i32_50 = arith.constant 1 : i32
    %c2_i32_51 = arith.constant 2 : i32
    %113 = arith.muli %c2_i32_51, %c1_i32_50 : i32
    %c8_i32_52 = arith.constant 8 : i32
    %114 = arith.muli %113, %c8_i32_52 : i32
    %115 = tpu.assume_multiple %114, 16 : i32
    %c0_53 = arith.constant 0 : index
    %116 = arith.index_cast %115 : i32 to index
    %c0_54 = arith.constant 0 : index
    %117 = vector.load %arg5[%c0_53, %116, %c0_54] : memref<1x32x128xbf16, #tpu.memory_space<vmem>>, vector<1x16x128xbf16>
    %118 = vector.shape_cast %117 : vector<1x16x128xbf16> to vector<16x128xbf16>
    %119 = arith.extf %118 : vector<16x128xbf16> to vector<16x128xf32>
    %120 = vector.broadcast %90 : vector<16x1xf32> to vector<16x128xf32>
    %121 = arith.mulf %119, %120 : vector<16x128xf32>
    %122 = vector.broadcast %91 : vector<16x1xf32> to vector<16x128xf32>
    %123 = arith.addf %121, %122 : vector<16x128xf32>
    %cst_55 = arith.constant 0.000000e+00 : f32
    %124 = vector.broadcast %cst_55 : f32 to vector<16x128xf32>
    %125 = arith.cmpf oge, %123, %124 : vector<16x128xf32>
    %cst_56 = arith.constant 0.00999999977 : f32
    %126 = vector.broadcast %cst_56 : f32 to vector<16x128xf32>
    %127 = arith.mulf %126, %123 : vector<16x128xf32>
    %128 = arith.select %125, %123, %127 : vector<16x128xi1>, vector<16x128xf32>
    %129 = arith.truncf %128 : vector<16x128xf32> to vector<16x128xbf16>
    %c0_57 = arith.constant 0 : index
    %130 = arith.index_cast %115 : i32 to index
    %c0_58 = arith.constant 0 : index
    %131 = vector.load %arg5[%c0_57, %130, %c0_58] : memref<1x32x128xbf16, #tpu.memory_space<vmem>>, vector<1x16x128xbf16>
    %132 = vector.shape_cast %131 : vector<1x16x128xbf16> to vector<16x128xbf16>
    %133 = vector.shape_cast %129 : vector<16x128xbf16> to vector<1x16x128xbf16>
    tpu.vector_store %arg5[%c0_57, %130, %c0_58], %133 {strides = array<i32>} : memref<1x32x128xbf16, #tpu.memory_space<vmem>>, vector<1x16x128xbf16>,
    %c2_i32_59 = arith.constant 2 : i32
    return
  }
  func.func @transform_0(%arg0: i32) -> (i32, i32, i32) {
    %c0_i32 = arith.constant 0 : i32
    %c0_i32_0 = arith.constant 0 : i32
    %c0_i32_1 = arith.constant 0 : i32
    return %arg0, %c0_i32, %c0_i32_0 : i32, i32, i32
  }
  func.func @transform_1(%arg0: i32) -> (i32, i32) {
    %c0_i32 = arith.constant 0 : i32
    %c0_i32_0 = arith.constant 0 : i32
    %c0_i32_1 = arith.constant 0 : i32
    return %c0_i32, %c0_i32_0 : i32, i32
  }
  func.func @transform_2(%arg0: i32) -> (i32, i32) {
    %c0_i32 = arith.constant 0 : i32
    %c0_i32_0 = arith.constant 0 : i32
    %c0_i32_1 = arith.constant 0 : i32
    return %c0_i32, %c0_i32_0 : i32, i32
  }
  func.func @transform_3(%arg0: i32) -> (i32, i32) {
    %c0_i32 = arith.constant 0 : i32
    %c0_i32_0 = arith.constant 0 : i32
    %c0_i32_1 = arith.constant 0 : i32
    return %c0_i32, %c0_i32_0 : i32, i32
  }
  func.func @transform_4(%arg0: i32) -> (i32, i32, i32) {
    %c0_i32 = arith.constant 0 : i32
    %c0_i32_0 = arith.constant 0 : i32
    %c0_i32_1 = arith.constant 0 : i32
    return %arg0, %c0_i32, %c0_i32_0 : i32, i32, i32
  }
}

</mosaic_0001>

<bundles_post_ra>
// kernel: encoder_block_forward.3
= control target key start
LH: loop header
LB: loop body
LE: loop exit
PB: predicated region body
PF: predicated region fallthrough
CT: control target
= control target key end

     0   :  { %s1109_s15 = smov 0   ;;  %s1199_s0 = inlined_call_operand.vmem [shape: bf16[2,480,128], index: 0, kind: input, shape index: {}]   ;;  %s1200_s1 = inlined_call_operand.vmem [shape: bf16[8,144], index: 1, kind: input, shape index: {}]   ;;  %s1201_s2 = inlined_call_operand.vmem [shape: f32[8,1], index: 2, kind: input, shape index: {}]   ;;  %s1202_s3 = inlined_call_operand.vmem [shape: f32[8,1], index: 3, kind: input, shape index: {}]   ;;  %s1203_s4 = inlined_call_operand.vmem [shape: bf16[2,32,128], index: 4, kind: output, shape index: {}]  }
   0x1 LB: > { %s771_s16 = sadd.s32 4294967295, %s1080_s15   ;;  %p775_p0 = scmp.ge.s32.totalorder %s1080_s15, 1  ;;  %s1080_s15 = sphi %s1109_s15, %s14_s15  }
   0x2   : > { %p162_p1 = scmp.lt.s32.totalorder %s1080_s15, 3 }
   0x4   : > { %p163_p2 = pnand %p775_p0, %p162_p1 }
   0x5   : > { %p188_p3 = scmp.lt.s32.totalorder (!%p163_p2), %s771_s16, 1 }
   0x6   : > { %166 = sbr.rel (%p163_p2) target bundleno = 483 (0x1e3), region = 36 }
   0xb   : > { %s1205_s16 = smov (!%p188_p3, %s771_s16), 1  ;;  %v1122_v0 = vld [vmem:[%s1200_s1] sm:$0xff]  ;;  %vm278_vm0 = vcmask 130048  }
   0xc   : > { %s1057_s19 = smul.u32 240, %s1205_s16  ;;  %v220_v1 = vunpack.c.h.b16 %v1122_v0  ;;  %v219_v31 = vunpack.c.l.b16 %v1122_v0  ;;  %s989_s27 = sshll.u32 %s1205_s16, 4 }
   0xd   : > { %s197_s30 = scalar_lea.vmem %s1203_s4, %s989_s27 }
   0xe   : > { %s1128_s22 = scalar_lea.vmem %s1199_s0, %s1057_s19  ;;  %v1139_v10 = vpack.c.b16 %v220_v1, %v220_v1  ;;  %v221_v38 = vpack.c.b16 %v219_v31, %v219_v31 }
   0xf   : > { %v997_v2 = vld [vmem:[%s1128_s22 + $0x38] sm:$0xff]  ;;  %v1006_v3 = vld [vmem:[%s1128_s22 + $0x68] sm:$0xff]  ;;  %v996_v4 = vld [vmem:[%s1128_s22 + $0x30] sm:$0xff] }
  0x10   : > { %282 = vmatpush.bf16.msra.mxu0 %v997_v2  ;;  %381 = vmatpush.bf16.msra.mxu2 %v1006_v3  ;;  %v1005_v5 = vld [vmem:[%s1128_s22 + $0x60] sm:$0xff]  ;;  %v1024_v7 = vld [vmem:[%s1128_s22 + $0xc8] sm:$0xff]  ;;  %v1015_v9 = vld [vmem:[%s1128_s22 + $0x98] sm:$0xff]  ;;  %v1082_v3 = vmov 64.0  }
  0x11   : > { %v1016_v6 = vld [vmem:[%s1128_s22 + $0xa0] sm:$0xff]  ;;  %v995_v12 = vld [vmem:[%s1128_s22 + $0x28] sm:$0xff]  ;;  %v1004_v13 = vld [vmem:[%s1128_s22 + $0x58] sm:$0xff]  ;;  %1070 = vrcp.f32 %v1082_v3 }
  0x12   : > { %v998_v8 = vld [vmem:[%s1128_s22 + $0x40] sm:$0xff]  ;;  %518 = vmatpush.bf16.msra.mxu3 %v1016_v6  ;;  %v1014_v14 = vld [vmem:[%s1128_s22 + $0x90] sm:$0xff]  ;;  %v1022_v15 = vld [vmem:[%s1128_s22 + $0xb8] sm:$0xff] }
  0x13   : > { %302 = vmatpush.bf16.msra.mxu1 %v998_v8  ;;  %v1023_v11 = vld [vmem:[%s1128_s22 + $0xc0] sm:$0xff]  ;;  %v1003_v17 = vld [vmem:[%s1128_s22 + $0x50] sm:$0xff]  ;;  %v1013_v18 = vld [vmem:[%s1128_s22 + $0x88] sm:$0xff] }
  0x14   : > { %283 = vmatpush.bf16.msra.mxu0 %v996_v4  ;;  %382 = vmatpush.bf16.msra.mxu2 %v1005_v5  ;;  %v994_v16 = vld [vmem:[%s1128_s22 + $0x20] sm:$0xff]  ;;  %v1021_v19 = vld [vmem:[%s1128_s22 + $0xb0] sm:$0xff]  ;;  %v993_v20 = vld [vmem:[%s1128_s22 + $0x18] sm:$0xff] }
  0x15   : > { %925 = vmatmul.msk.bf16.vlgmr.msra.gmra.mxu3 %vm278_vm0, %v1139_v10  ;;  %v1002_v21 = vld [vmem:[%s1128_s22 + $0x48] sm:$0xff]  ;;  %v1012_v22 = vld [vmem:[%s1128_s22 + $0x80] sm:$0xff]  ;;  %v992_v24 = vld [vmem:[%s1128_s22 + $0x10] sm:$0xff] }
  0x16   : > { %597 = vmatpush.bf16.msrb.mxu3 %v1024_v7  ;;  %815 = vmatmul.msk.bf16.vlgmr.msra.gmra.mxu1 %vm278_vm0, %v1139_v10  ;;  %v1020_v23 = vld [vmem:[%s1128_s22 + $0xa8] sm:$0xff]  ;;  %v1001_v25 = vld [vmem:[%s1128_s22 + $0x40] sm:$0xff]  ;;  %v1011_v26 = vld [vmem:[%s1128_s22 + $0x78] sm:$0xff] }
  0x17   : > { %498 = vmatpush.bf16.msrb.mxu1 %v1015_v9  ;;  %v1019_v27 = vld [vmem:[%s1128_s22 + $0xa0] sm:$0xff]  ;;  %v991_v28 = vld [vmem:[%s1128_s22 + $0x8] sm:$0xff]  ;;  %v1000_v29 = vld [vmem:[%s1128_s22 + $0x38] sm:$0xff]  ;;  %v1071_v4 = vpop.eup %1070 }
  0x18   : > { %284 = vmatpush.bf16.msra.mxu0 %v995_v12  ;;  %383 = vmatpush.bf16.msra.mxu2 %v1004_v13  ;;  %v1010_v30 = vld [vmem:[%s1128_s22 + $0x70] sm:$0xff]  ;;  %v1018_v32 = vld [vmem:[%s1128_s22 + $0x98] sm:$0xff]  ;;  %v990_v33 = vld [vmem:[%s1128_s22] sm:$0xff]  ;;  %v643_v5 = vmul.f32 64.0, %v1071_v4  ;;  %vm647_vm1 = vweird.f32 %v1071_v4 }
  0x19   : > { %v999_v34 = vld [vmem:[%s1128_s22 + $0x30] sm:$0xff]  ;;  %v1009_v36 = vld [vmem:[%s1128_s22 + $0x68] sm:$0xff]  ;;  %v1008_v40 = vld [vmem:[%s1128_s22 + $0x60] sm:$0xff] }
  0x1a   : > { %598 = vmatpush.bf16.msrb.mxu3 %v1023_v11  ;;  %v1007_v35 = vld [vmem:[%s1128_s22 + $0x70] sm:$0xff]  ;;  %v644_v9 = vsub.f32 1.0, %v643_v5  ;;  %v1083_v11 = vmov 0  }
  0x1b   : > { %499 = vmatpush.bf16.msrb.mxu1 %v1014_v14  ;;  %v1025_v37 = vld [vmem:[%s1128_s22 + $0xd0] sm:$0xff]  ;;  %1068 = vset.pattern.permute.xlu2 %v1083_v11 }
  0x1c   : > { %285 = vmatpush.bf16.msra.mxu0 %v994_v16  ;;  %384 = vmatpush.bf16.msra.mxu2 %v1003_v17  ;;  %v1017_v39 = vld [vmem:[%s1128_s22 + $0x90] sm:$0xff] }
  0x1d   : > { %1069 = vset.pattern.permute.xlu0 %v1083_v11 }
  0x1e   : > { %599 = vmatpush.bf16.msrb.mxu3 %v1022_v15 }
  0x1f   : > { %500 = vmatpush.bf16.msrb.mxu1 %v1013_v18 }
  0x20   : > { %286 = vmatpush.bf16.msra.mxu0 %v993_v20  ;;  %385 = vmatpush.bf16.msra.mxu2 %v1002_v21 }
  0x22   : > { %600 = vmatpush.bf16.msrb.mxu3 %v1021_v19 }
  0x23   : > { %501 = vmatpush.bf16.msrb.mxu1 %v1012_v22 }
  0x24   : > { %287 = vmatpush.bf16.msra.mxu0 %v992_v24  ;;  %386 = vmatpush.bf16.msra.mxu2 %v1001_v25 }
  0x26   : > { %601 = vmatpush.bf16.msrb.mxu3 %v1020_v23 }
  0x27   : > { %502 = vmatpush.bf16.msrb.mxu1 %v1011_v26 }
  0x28   : > { %288 = vmatpush.bf16.msra.mxu0 %v991_v28  ;;  %387 = vmatpush.bf16.msra.mxu2 %v1000_v29 }
  0x2a   : > { %602 = vmatpush.bf16.msrb.mxu3 %v1019_v27 }
  0x2b   : > { %503 = vmatpush.bf16.msrb.mxu1 %v1010_v30 }
  0x2c   : > { %289 = vmatpush.bf16.msra.mxu0 %v990_v33  ;;  %388 = vmatpush.bf16.msra.mxu2 %v999_v34 }
  0x2e   : > { %603 = vmatpush.bf16.msrb.mxu3 %v1018_v32 }
  0x2f   : > { %504 = vmatpush.bf16.msrb.mxu1 %v1009_v36  ;;  %290 = vmatmul.bf16.vlgmr.msra.gmra.mxu0 %v221_v38  ;;  %v654_v36 = vld [vmem:[%s1201_s2] sm:$0xff] }
  0x30   : > { %401 = vmatpush.bf16.msrb.mxu2 %v1007_v35  ;;  %617 = vmatpush.bf16.msrb.mxu0 %v1025_v37 }
  0x31   : > { %389 = vmatmul.bf16.vlgmr.msra.gmra.mxu2 %v221_v38 }
  0x32   : > { %604 = vmatpush.bf16.msrb.mxu3 %v1017_v39 }
  0x33   : > { %505 = vmatpush.bf16.msrb.mxu1 %v1008_v40  ;;  %v667_v40 = vld [vmem:[%s1202_s3] sm:$0xff] }
  0x35   : > { %605 = vmatmul.bf16.vlgmr.msrb.gmra.mxu3 %v221_v38 }
  0x36   : > { %506 = vmatmul.bf16.vlgmr.msrb.gmra.mxu1 %v221_v38 }
  0x3f   : > { %980 = vmatmul.msk.bf16.vlgmr.msrb.gmra.mxu0 %vm278_vm0, %v1139_v10 }
  0x41   : > { %870 = vmatmul.msk.bf16.vlgmr.msrb.gmra.mxu2 %vm278_vm0, %v1139_v10  ;;  %v645_v10 = vmul.f32 %v1071_v4, %v644_v9 }
  0x43   : > { %v646_v15 = vadd.f32 %v1071_v4, %v645_v10 }
  0x45   : > { %v648_v19 = vsel %vm647_vm1, %v1071_v4, %v646_v15 }
  0x93   : > { %v304_v41 = vpop.f32.mrf.mxu1 }
  0x98   : > { %v520_v42 = vpop.f32.mrf.mxu3 }
  0x9b   : > { %v306_v43 = vpop.f32.mrf.mxu1 }
  0xa0   : > { %v522_v44 = vpop.f32.mrf.mxu3 }
  0xac   : > { %v291_v45 = vpop.f32.mrf.mxu0 }
  0xad   : > { %v305_v46 = vadd.f32 %v304_v41, %v291_v45 }
  0xaf   : > { %407 = vadd.xlane.f32.xlu0 %v305_v46  ;;  %v413_v47 = vmul.f32 %v305_v46, %v305_v46 }
  0xb1   : > { %414 = vadd.xlane.f32.xlu1 %v413_v47 }
  0xb3   : > { %v507_v48 = vpop.f32.mrf.mxu1 }
  0xb4   : > { %v390_v49 = vpop.f32.mrf.mxu2  ;;  %v521_v50 = vadd.f32 %v520_v42, %v507_v48  ;;  %v293_v51 = vpop.f32.mrf.mxu0 }
  0xb6   : > { %623 = vadd.xlane.f32.xlu2 %v521_v50  ;;  %v629_v1 = vmul.f32 %v521_v50, %v521_v50 }
  0xb8   : > { %v606_v52 = vpop.f32.mrf.mxu3 }
  0xbb   : > { %v509_v53 = vpop.f32.mrf.mxu1 }
  0xbc   : > { %v392_v54 = vpop.f32.mrf.mxu2  ;;  %v619_v55 = vpop.f32.mrf.mxu0 }
  0xbd   : > { %v620_v56 = vadd.f32 %v619_v55, %v606_v52 }
  0xbf   : > { %v1178_v58 = vpack.c.bf16 %v620_v56, %v521_v50  ;;  %626 = vadd.xlane.f32.xlu2 %v620_v56  ;;  %v633_v2 = vmul.f32 %v620_v56, %v620_v56 }
  0xc0   : > { %v608_v57 = vpop.f32.mrf.mxu3 }
  0xc1   : > { %v1048_v47 = vunpack.c.h.bf16 %v1178_v58 }
  0xc4   : > { %v403_v59 = vpop.f32.mrf.mxu2  ;;  %v621_v61 = vpop.f32.mrf.mxu0 }
  0xc5   : > { %v404_v60 = vadd.f32 %v403_v59, %v390_v49 }
  0xc7   : > { %v1180_v62 = vpack.c.bf16 %v404_v60, %v305_v46  ;;  %410 = vadd.xlane.f32.xlu0 %v404_v60  ;;  %v417_v63 = vmul.f32 %v404_v60, %v404_v60  ;;  %v1047_v46 = vunpack.c.l.bf16 %v1178_v58 }
  0xc9   : > { %418 = vadd.xlane.f32.xlu1 %v417_v63  ;;  %v1038_v44 = vunpack.c.l.bf16 %v1180_v62  ;;  %v1039_v45 = vunpack.c.h.bf16 %v1180_v62 }
  0xcc   : > { %v405_v0 = vpop.f32.mrf.mxu2 }
  0xcf   : > { %630 = vadd.xlane.f32.xlu0 %v629_v1 }
  0xd1   : > { %634 = vadd.xlane.f32.xlu1 %v633_v2 }
 0x122   : > { %v408_v6 = vpop.xlane.xlu0 %407 }
 0x124   : > { %v415_v7 = vpop.xlane.xlu1 %414 }
 0x129   : > { %v624_v8 = vpop.xlane.xlu2 %623 }
 0x132   : > { %v627_v16 = vpop.xlane.xlu2 %626 }
 0x13a   : > { %v411_v12 = vpop.xlane.xlu0 %410 }
 0x13b   : > { %v412_v13 = vadd.f32 %v411_v12, %v408_v6 }
 0x13c   : > { %v419_v14 = vpop.xlane.xlu1 %418 }
 0x13d   : > { %v625_v17 = vadd.f32 %v624_v8, %v412_v13  ;;  %v420_v20 = vadd.f32 %v419_v14, %v415_v7 }
 0x13f   : > { %v628_v18 = vadd.f32 %v627_v16, %v625_v17 }
 0x141   : > { %v649_v22 = vmul.f32 %v648_v19, %v628_v18 }
 0x142   : > { %v631_v21 = vpop.xlane.xlu0 %630 }
 0x143   : > { %v632_v23 = vadd.f32 %v631_v21, %v420_v20  ;;  %v651_v26 = vmul.f32 %v649_v22, %v649_v22 }
 0x144   : > { %v635_v24 = vpop.xlane.xlu1 %634 }
 0x145   : > { %v636_v25 = vadd.f32 %v635_v24, %v632_v23 }
 0x147   : > { %v650_v27 = vmul.f32 %v648_v19, %v636_v25 }
 0x149   : > { %v652_v28 = vsub.f32 %v650_v27, %v651_v26 }
 0x14b   : > { %v653_v29 = vmax.f32 %v652_v28, 0.0 }
 0x14d   : > { %v655_v30 = vadd.f32 1e-05, %v653_v29 }
 0x14f   : > { %1072 = vrsqrt.f32 %v655_v30  ;;  %vm662_vm3 = vweird.f32 %v655_v30 }
 0x155   : > { %v1073_v31 = vpop.eup %1072 }
 0x156   : > { %v657_v32 = vmul.f32 %v1073_v31, %v655_v30  ;;  %vm663_vm2 = vweird.f32 %v1073_v31 }
 0x157   : > { %vm664_vm4 = vmor %vm662_vm3, %vm663_vm2 }
 0x158   : > { %v658_v33 = vmul.f32 %v1073_v31, %v657_v32 }
 0x15a   : > { %v659_v34 = vmul.f32 0.5, %v658_v33 }
 0x15c   : > { %v660_v35 = vsub.f32 1.5, %v659_v34 }
 0x15e   : > { %v661_v37 = vmul.f32 %v1073_v31, %v660_v35 }
 0x160   : > { %v665_v38 = vsel %vm664_vm4, %v1073_v31, %v661_v37 }
 0x161   : > { %v666_v39 = vmul.f32 %v665_v38, %v654_v36 }
 0x163   : > { %676 = vperm.xlu2 %1068, %v666_v39   ;;  %v668_v41 = vmul.f32 %v666_v39, %v649_v22 }
 0x165   : > { %v669_v42 = vsub.f32 %v667_v40, %v668_v41 }
 0x167   : > { %683 = vperm.xlu0 %1069, %v669_v42  }
 0x1bd   : > { %v677_v43 = vpop.permute.xlu2 %676 }
 0x1be   : > { %v679_v48 = vmul.f32 %v1038_v44, %v677_v43  ;;  %v680_v49 = vmul.f32 %v1039_v45, %v677_v43  ;;  %v702_v50 = vmul.f32 %v1047_v46, %v677_v43  ;;  %v703_v51 = vmul.f32 %v1048_v47, %v677_v43 }
 0x1d9   : > { %v684_v52 = vpop.permute.xlu0 %683 }
 0x1da   : > { %v686_v53 = vadd.f32 %v684_v52, %v679_v48  ;;  %v687_v54 = vadd.f32 %v684_v52, %v680_v49  ;;  %v704_v55 = vadd.f32 %v702_v50, %v684_v52  ;;  %v705_v56 = vadd.f32 %v703_v51, %v684_v52 }
 0x1dc   : > { %vm688_vm5 = vcmp.ge.f32.partialorder %v686_v53, 0.0  ;;  %vm689_vm6 = vcmp.ge.f32.partialorder %v687_v54, 0.0  ;;  %v690_v57 = vmul.f32 0.01, %v686_v53  ;;  %v691_v59 = vmul.f32 0.01, %v687_v54 }
 0x1dd   : > { %vm706_vm7 = vcmp.ge.f32.partialorder %v704_v55, 0.0  ;;  %vm707_vm8 = vcmp.ge.f32.partialorder %v705_v56, 0.0  ;;  %v708_v60 = vmul.f32 0.01, %v704_v55  ;;  %v709_v61 = vmul.f32 0.01, %v705_v56 }
 0x1de   : > { %v692_v58 = vsel %vm688_vm5, %v686_v53, %v690_v57  ;;  %v693_v62 = vsel %vm689_vm6, %v687_v54, %v691_v59 }
 0x1df   : > { %v1043_v63 = vpack.c.bf16 %v693_v62, %v692_v58  ;;  %v710_v0 = vsel %vm706_vm7, %v704_v55, %v708_v60  ;;  %v711_v1 = vsel %vm707_vm8, %v705_v56, %v709_v61 }
 0x1e0   : > { %v1052_v2 = vpack.c.bf16 %v711_v1, %v710_v0 }
 0x1e1   : > { %1044 = vst [vmem:[%s197_s30] sm:$0xff] %v1043_v63  }
 0x1e2   : > { %1056 = vst [vmem:[%s197_s30 + $0x8] sm:$0xff] %v1052_v2  }
 0x1e3 PF: > { %s14_s15 = sadd.s32 1, %s1080_s15  }
 0x1e4   : > { %p11_p4 = scmp.ge.s32.totalorder %s14_s15, 4  }
 0x1e6   :  { %13 = sbr.rel (!%p11_p4) target bundleno = 1 (0x1), region = 70 }

// kernel: encoder_block_forward.5
= control target key start
LH: loop header
LB: loop body
LE: loop exit
PB: predicated region body
PF: predicated region fallthrough
CT: control target
= control target key end

     0   :  { %s1548_s18 = smov 0   ;;  %s1665_s0 = inlined_call_operand.vmem [shape: bf16[2,480,128], index: 0, kind: input, shape index: {}]   ;;  %s1666_s1 = inlined_call_operand.vmem [shape: bf16[8,240], index: 1, kind: input, shape index: {}]   ;;  %s1667_s2 = inlined_call_operand.vmem [shape: f32[8,1], index: 2, kind: input, shape index: {}]   ;;  %s1668_s3 = inlined_call_operand.vmem [shape: f32[8,1], index: 3, kind: input, shape index: {}]   ;;  %s1669_s4 = inlined_call_operand.vmem [shape: bf16[2,32,128], index: 4, kind: input, shape index: {}]   ;;  %s1670_s5 = inlined_call_operand.vmem [shape: bf16[2,32,128], index: 5, kind: output, shape index: {}]  }
   0x1 LB: > { %s1035_s19 = sadd.s32 4294967295, %s1514_s18   ;;  %p1039_p0 = scmp.ge.s32.totalorder %s1514_s18, 1  ;;  %s1514_s18 = sphi %s1548_s18, %s15_s18  }
   0x2   : > { %p197_p1 = scmp.lt.s32.totalorder %s1514_s18, 3 }
   0x4   : > { %p198_p2 = pnand %p1039_p0, %p197_p1 }
   0x5   : > { %p230_p3 = scmp.lt.s32.totalorder (!%p198_p2), %s1035_s19, 1 }
   0x6   : > { %201 = sbr.rel (%p198_p2) target bundleno = 492 (0x1ec), region = 40 }
   0xb   : > { %s1672_s19 = smov (!%p230_p3, %s1035_s19), 1  ;;  %v246_v24 = vld [vmem:[%s1666_s1] sm:$0xff]  ;;  %vm373_vm0 = vcmask 916480  }
   0xc   : > { %s1491_s20 = smul.u32 240, %s1672_s19  ;;  %v279_v27 = vunpack.c.h.b16 %v246_v24  ;;  %v278_v32 = vunpack.c.l.b16 %v246_v24  ;;  %s1389_s30 = sshll.u32 %s1672_s19, 4 }
   0xd   : > { %s239_s8 = scalar_lea.vmem %s1669_s4, %s1389_s30  ;;  %s244_s11 = scalar_lea.vmem %s1670_s5, %s1389_s30 }
   0xe   : > { %s1562_s23 = scalar_lea.vmem %s1665_s0, %s1491_s20  ;;  %v1598_v34 = vpack.c.b16 %v279_v27, %v279_v27  ;;  %v280_v40 = vpack.c.b16 %v278_v32, %v278_v32  ;;  %v1516_v27 = vmov 64.0  }
   0xf   : > { %v1398_v0 = vld [vmem:[%s1562_s23 + $0x38] sm:$0xff]  ;;  %v1405_v1 = vld [vmem:[%s1562_s23 + $0x70] sm:$0xff]  ;;  %v1413_v2 = vld [vmem:[%s1562_s23 + $0x60] sm:$0xff]  ;;  %1504 = vrcp.f32 %v1516_v27 }
  0x10   : > { %v1420_v3 = vld [vmem:[%s1562_s23 + $0x98] sm:$0xff]  ;;  %377 = vmatpush.bf16.msra.mxu0 %v1398_v0  ;;  %391 = vmatpush.bf16.msra.mxu1 %v1405_v1  ;;  %v1397_v4 = vld [vmem:[%s1562_s23 + $0x30] sm:$0xff]  ;;  %v1404_v5 = vld [vmem:[%s1562_s23 + $0x68] sm:$0xff] }
  0x11   : > { %524 = vmatpush.bf16.msra.mxu2 %v1413_v2  ;;  %538 = vmatpush.bf16.msra.mxu3 %v1420_v3  ;;  %v1412_v6 = vld [vmem:[%s1562_s23 + $0x58] sm:$0xff]  ;;  %v1419_v7 = vld [vmem:[%s1562_s23 + $0x90] sm:$0xff]  ;;  %v1396_v8 = vld [vmem:[%s1562_s23 + $0x28] sm:$0xff] }
  0x12   : > { %v1403_v9 = vld [vmem:[%s1562_s23 + $0x60] sm:$0xff]  ;;  %v1411_v10 = vld [vmem:[%s1562_s23 + $0x50] sm:$0xff]  ;;  %v1418_v11 = vld [vmem:[%s1562_s23 + $0x88] sm:$0xff] }
  0x13   : > { %v1395_v12 = vld [vmem:[%s1562_s23 + $0x20] sm:$0xff]  ;;  %v1402_v13 = vld [vmem:[%s1562_s23 + $0x58] sm:$0xff]  ;;  %v1410_v14 = vld [vmem:[%s1562_s23 + $0x48] sm:$0xff] }
  0x14   : > { %378 = vmatpush.bf16.msra.mxu0 %v1397_v4  ;;  %392 = vmatpush.bf16.msra.mxu1 %v1404_v5  ;;  %v1417_v15 = vld [vmem:[%s1562_s23 + $0x80] sm:$0xff]  ;;  %v1394_v16 = vld [vmem:[%s1562_s23 + $0x18] sm:$0xff]  ;;  %v1401_v17 = vld [vmem:[%s1562_s23 + $0x50] sm:$0xff] }
  0x15   : > { %525 = vmatpush.bf16.msra.mxu2 %v1412_v6  ;;  %539 = vmatpush.bf16.msra.mxu3 %v1419_v7  ;;  %v1409_v18 = vld [vmem:[%s1562_s23 + $0x40] sm:$0xff]  ;;  %v1416_v19 = vld [vmem:[%s1562_s23 + $0x78] sm:$0xff]  ;;  %v1393_v20 = vld [vmem:[%s1562_s23 + $0x10] sm:$0xff] }
  0x16   : > { %v1400_v21 = vld [vmem:[%s1562_s23 + $0x48] sm:$0xff]  ;;  %v1408_v22 = vld [vmem:[%s1562_s23 + $0x38] sm:$0xff]  ;;  %v1415_v23 = vld [vmem:[%s1562_s23 + $0x70] sm:$0xff] }
  0x17   : > { %v1392_v25 = vld [vmem:[%s1562_s23 + $0x8] sm:$0xff]  ;;  %v1399_v26 = vld [vmem:[%s1562_s23 + $0x40] sm:$0xff]  ;;  %v1407_v28 = vld [vmem:[%s1562_s23 + $0x30] sm:$0xff] }
  0x18   : > { %379 = vmatpush.bf16.msra.mxu0 %v1396_v8  ;;  %393 = vmatpush.bf16.msra.mxu1 %v1403_v9  ;;  %v1414_v29 = vld [vmem:[%s1562_s23 + $0x68] sm:$0xff]  ;;  %v1435_v31 = vld [vmem:[%s1562_s23 + $0xc0] sm:$0xff]  ;;  %v1443_v36 = vld [vmem:[%s1562_s23 + $0xb0] sm:$0xff] }
  0x19   : > { %526 = vmatpush.bf16.msra.mxu2 %v1411_v10  ;;  %540 = vmatpush.bf16.msra.mxu3 %v1418_v11  ;;  %v1428_v30 = vld [vmem:[%s1562_s23 + $0x88] sm:$0xff]  ;;  %v1391_v33 = vld [vmem:[%s1562_s23] sm:$0xff]  ;;  %v1434_v38 = vld [vmem:[%s1562_s23 + $0xb8] sm:$0xff] }
  0x1a   : > { %v1406_v35 = vld [vmem:[%s1562_s23 + $0x28] sm:$0xff]  ;;  %v1427_v37 = vld [vmem:[%s1562_s23 + $0x80] sm:$0xff]  ;;  %v1426_v42 = vld [vmem:[%s1562_s23 + $0x78] sm:$0xff] }
  0x1b   : > { %v1450_v39 = vld [vmem:[%s1562_s23 + $0xe8] sm:$0xff]  ;;  %v1433_v43 = vld [vmem:[%s1562_s23 + $0xb0] sm:$0xff]  ;;  %v1449_v44 = vld [vmem:[%s1562_s23 + $0xe0] sm:$0xff] }
  0x1c   : > { %380 = vmatpush.bf16.msra.mxu0 %v1395_v12  ;;  %394 = vmatpush.bf16.msra.mxu1 %v1402_v13  ;;  %v1442_v41 = vld [vmem:[%s1562_s23 + $0xa8] sm:$0xff]  ;;  %v1441_v45 = vld [vmem:[%s1562_s23 + $0xa0] sm:$0xff]  ;;  %v1425_v46 = vld [vmem:[%s1562_s23 + $0x70] sm:$0xff] }
  0x1d   : > { %527 = vmatpush.bf16.msra.mxu2 %v1410_v14  ;;  %541 = vmatpush.bf16.msra.mxu3 %v1417_v15  ;;  %v1432_v47 = vld [vmem:[%s1562_s23 + $0xa8] sm:$0xff]  ;;  %v1448_v48 = vld [vmem:[%s1562_s23 + $0xd8] sm:$0xff]  ;;  %v1431_v51 = vld [vmem:[%s1562_s23 + $0xa0] sm:$0xff] }
  0x1e   : > { %v1440_v49 = vld [vmem:[%s1562_s23 + $0x98] sm:$0xff]  ;;  %v1424_v50 = vld [vmem:[%s1562_s23 + $0x68] sm:$0xff]  ;;  %v1447_v52 = vld [vmem:[%s1562_s23 + $0xd0] sm:$0xff] }
  0x1f   : > { %v1439_v53 = vld [vmem:[%s1562_s23 + $0x90] sm:$0xff]  ;;  %v1423_v54 = vld [vmem:[%s1562_s23 + $0x60] sm:$0xff]  ;;  %v1430_v55 = vld [vmem:[%s1562_s23 + $0x98] sm:$0xff] }
  0x20   : > { %381 = vmatpush.bf16.msra.mxu0 %v1394_v16  ;;  %395 = vmatpush.bf16.msra.mxu1 %v1401_v17  ;;  %v1446_v56 = vld [vmem:[%s1562_s23 + $0xc8] sm:$0xff]  ;;  %v1422_v58 = vld [vmem:[%s1562_s23 + $0x58] sm:$0xff]  ;;  %v1429_v59 = vld [vmem:[%s1562_s23 + $0x90] sm:$0xff] }
  0x21   : > { %528 = vmatpush.bf16.msra.mxu2 %v1409_v18  ;;  %542 = vmatpush.bf16.msra.mxu3 %v1416_v19  ;;  %v1438_v57 = vld [vmem:[%s1562_s23 + $0x88] sm:$0xff]  ;;  %v1445_v60 = vld [vmem:[%s1562_s23 + $0xc0] sm:$0xff]  ;;  %v1421_v62 = vld [vmem:[%s1562_s23 + $0x50] sm:$0xff] }
  0x22   : > { %v1437_v61 = vld [vmem:[%s1562_s23 + $0x80] sm:$0xff]  ;;  %v1444_v63 = vld [vmem:[%s1562_s23 + $0xb8] sm:$0xff] }
  0x23   : > { %v1436_v0 = vld [vmem:[%s1562_s23 + $0x78] sm:$0xff] }
  0x24   : > { %382 = vmatpush.bf16.msra.mxu0 %v1393_v20  ;;  %396 = vmatpush.bf16.msra.mxu1 %v1400_v21 }
  0x25   : > { %529 = vmatpush.bf16.msra.mxu2 %v1408_v22  ;;  %543 = vmatpush.bf16.msra.mxu3 %v1415_v23 }
  0x28   : > { %383 = vmatpush.bf16.msra.mxu0 %v1392_v25  ;;  %397 = vmatpush.bf16.msra.mxu1 %v1399_v26 }
  0x29   : > { %530 = vmatpush.bf16.msra.mxu2 %v1407_v28  ;;  %544 = vmatpush.bf16.msra.mxu3 %v1414_v29 }
  0x2b   : > { %1105 = vmatmul.msk.bf16.vlgmr.msra.gmra.mxu1 %vm373_vm0, %v1598_v34 }
  0x2c   : > { %689 = vmatpush.bf16.msrb.mxu1 %v1428_v30  ;;  %384 = vmatpush.bf16.msra.mxu0 %v1391_v33  ;;  %v1505_v30 = vpop.eup %1504  ;;  %v1517_v33 = vmov 0  }
  0x2d   : > { %703 = vmatpush.bf16.msrb.mxu3 %v1435_v31  ;;  %531 = vmatpush.bf16.msra.mxu2 %v1406_v35  ;;  %v882_v31 = vmul.f32 64.0, %v1505_v30  ;;  %vm886_vm1 = vweird.f32 %v1505_v30 }
  0x2e   : > { %1196 = vmatmul.msk.bf16.vlgmr.msra.gmra.mxu3 %vm373_vm0, %v1598_v34  ;;  %1502 = vset.pattern.permute.xlu2 %v1517_v33 }
  0x2f   : > { %385 = vmatmul.bf16.vlgmr.msra.gmra.mxu0 %v280_v40  ;;  %1503 = vset.pattern.permute.xlu0 %v1517_v33 }
  0x30   : > { %836 = vmatpush.bf16.msrb.mxu0 %v1443_v36  ;;  %690 = vmatpush.bf16.msrb.mxu1 %v1427_v37 }
  0x31   : > { %704 = vmatpush.bf16.msrb.mxu3 %v1434_v38  ;;  %850 = vmatpush.bf16.msrb.mxu2 %v1450_v39 }
  0x32   : > { %532 = vmatmul.bf16.vlgmr.msra.gmra.mxu2 %v280_v40 }
  0x34   : > { %837 = vmatpush.bf16.msrb.mxu0 %v1442_v41  ;;  %691 = vmatpush.bf16.msrb.mxu1 %v1426_v42 }
  0x35   : > { %705 = vmatpush.bf16.msrb.mxu3 %v1433_v43  ;;  %851 = vmatpush.bf16.msrb.mxu2 %v1449_v44 }
  0x38   : > { %838 = vmatpush.bf16.msrb.mxu0 %v1441_v45  ;;  %692 = vmatpush.bf16.msrb.mxu1 %v1425_v46 }
  0x39   : > { %706 = vmatpush.bf16.msrb.mxu3 %v1432_v47  ;;  %852 = vmatpush.bf16.msrb.mxu2 %v1448_v48 }
  0x3c   : > { %839 = vmatpush.bf16.msrb.mxu0 %v1440_v49  ;;  %693 = vmatpush.bf16.msrb.mxu1 %v1424_v50 }
  0x3d   : > { %707 = vmatpush.bf16.msrb.mxu3 %v1431_v51  ;;  %853 = vmatpush.bf16.msrb.mxu2 %v1447_v52 }
  0x40   : > { %840 = vmatpush.bf16.msrb.mxu0 %v1439_v53  ;;  %694 = vmatpush.bf16.msrb.mxu1 %v1423_v54 }
  0x41   : > { %708 = vmatpush.bf16.msrb.mxu3 %v1430_v55  ;;  %854 = vmatpush.bf16.msrb.mxu2 %v1446_v56 }
  0x44   : > { %841 = vmatpush.bf16.msrb.mxu0 %v1438_v57  ;;  %695 = vmatpush.bf16.msrb.mxu1 %v1422_v58 }
  0x45   : > { %709 = vmatpush.bf16.msrb.mxu3 %v1429_v59  ;;  %855 = vmatpush.bf16.msrb.mxu2 %v1445_v60  ;;  %v893_v60 = vld [vmem:[%s1667_s2] sm:$0xff] }
  0x48   : > { %1287 = vmatmul.msk.bf16.vlgmr.msrb.gmra.mxu3 %vm373_vm0, %v1598_v34  ;;  %842 = vmatpush.bf16.msrb.mxu0 %v1437_v61 }
  0x49   : > { %696 = vmatpush.bf16.msrb.mxu1 %v1421_v62  ;;  %856 = vmatpush.bf16.msrb.mxu2 %v1444_v63 }
  0x4c   : > { %697 = vmatmul.bf16.vlgmr.msrb.gmra.mxu1 %v280_v40  ;;  %843 = vmatpush.bf16.msrb.mxu0 %v1436_v0  ;;  %v906_v0 = vld [vmem:[%s1668_s3] sm:$0xff] }
  0x4d   : > { %1378 = vmatmul.msk.bf16.vlgmr.msrb.gmra.mxu2 %vm373_vm0, %v1598_v34  ;;  %v883_v34 = vsub.f32 1.0, %v882_v31 }
  0x4f   : > { %844 = vmatmul.bf16.vlgmr.msrb.gmra.mxu0 %v280_v40  ;;  %v884_v37 = vmul.f32 %v1505_v30, %v883_v34 }
  0x51   : > { %v885_v41 = vadd.f32 %v1505_v30, %v884_v37 }
  0x53   : > { %v887_v48 = vsel %vm886_vm1, %v1505_v30, %v885_v41 }
  0xa8   : > { %v399_v1 = vpop.f32.mrf.mxu1 }
  0xac   : > { %v386_v2 = vpop.f32.mrf.mxu0 }
  0xad   : > { %v400_v3 = vadd.f32 %v399_v1, %v386_v2 }
  0xaf   : > { %550 = vadd.xlane.f32.xlu0 %v400_v3  ;;  %v556_v5 = vmul.f32 %v400_v3, %v400_v3 }
  0xb0   : > { %v401_v6 = vpop.f32.mrf.mxu1 }
  0xb1   : > { %v546_v4 = vpop.f32.mrf.mxu3  ;;  %557 = vadd.xlane.f32.xlu1 %v556_v5 }
  0xb4   : > { %v388_v9 = vpop.f32.mrf.mxu0 }
  0xb5   : > { %v533_v7 = vpop.f32.mrf.mxu2 }
  0xb6   : > { %v547_v8 = vadd.f32 %v546_v4, %v533_v7  ;;  %v1489_v4 = vld [vmem:[%s239_s8 + $0x8] sm:$0xff]  }
  0xb8   : > { %v1637_v10 = vpack.c.bf16 %v547_v8, %v400_v3  ;;  %v560_v11 = vmul.f32 %v547_v8, %v547_v8  ;;  %553 = vadd.xlane.f32.xlu0 %v547_v8  ;;  %v1466_v3 = vld [vmem:[%s239_s8] sm:$0xff]  }
  0xb9   : > { %v548_v12 = vpop.f32.mrf.mxu3 }
  0xba   : > { %561 = vadd.xlane.f32.xlu1 %v560_v11  ;;  %v1463_v6 = vunpack.c.l.bf16 %v1637_v10  ;;  %v1464_v7 = vunpack.c.h.bf16 %v1637_v10  ;;  %v1467_v11 = vunpack.c.l.bf16 %v1466_v3  ;;  %v1468_v12 = vunpack.c.h.bf16 %v1466_v3 }
  0xbd   : > { %v535_v13 = vpop.f32.mrf.mxu2 }
  0xbe   : > { %v1480_v13 = vunpack.c.l.bf16 %v1489_v4 }
  0xc9   : > { %v698_v14 = vpop.f32.mrf.mxu1 }
  0xcb   : > { %v711_v15 = vpop.f32.mrf.mxu3 }
  0xcc   : > { %v712_v16 = vadd.f32 %v711_v15, %v698_v14  ;;  %v845_v17 = vpop.f32.mrf.mxu0  ;;  %v1481_v14 = vunpack.c.h.bf16 %v1489_v4 }
  0xce   : > { %862 = vadd.xlane.f32.xlu2 %v712_v16  ;;  %v868_v18 = vmul.f32 %v712_v16, %v712_v16 }
  0xd0   : > { %v858_v19 = vpop.f32.mrf.mxu2  ;;  %869 = vadd.xlane.f32.xlu0 %v868_v18 }
  0xd1   : > { %v859_v20 = vadd.f32 %v858_v19, %v845_v17  ;;  %v700_v21 = vpop.f32.mrf.mxu1 }
  0xd3   : > { %v1639_v22 = vpack.c.bf16 %v859_v20, %v712_v16  ;;  %v713_v23 = vpop.f32.mrf.mxu3  ;;  %v872_v24 = vmul.f32 %v859_v20, %v859_v20 }
  0xd4   : > { %v847_v25 = vpop.f32.mrf.mxu0 }
  0xd5   : > { %873 = vadd.xlane.f32.xlu1 %v872_v24  ;;  %v1476_v8 = vunpack.c.l.bf16 %v1639_v22  ;;  %v1477_v9 = vunpack.c.h.bf16 %v1639_v22 }
  0xd6   : > { %865 = vadd.xlane.f32.xlu2 %v859_v20 }
  0xd8   : > { %v860_v26 = vpop.f32.mrf.mxu2 }
 0x122   : > { %v551_v28 = vpop.xlane.xlu0 %550 }
 0x124   : > { %v558_v29 = vpop.xlane.xlu1 %557 }
 0x12b   : > { %v554_v32 = vpop.xlane.xlu0 %553 }
 0x12c   : > { %v555_v39 = vadd.f32 %v554_v32, %v551_v28 }
 0x12d   : > { %v562_v35 = vpop.xlane.xlu1 %561 }
 0x12e   : > { %v563_v40 = vadd.f32 %v562_v35, %v558_v29 }
 0x141   : > { %v863_v36 = vpop.xlane.xlu2 %862 }
 0x142   : > { %v864_v42 = vadd.f32 %v863_v36, %v555_v39 }
 0x143   : > { %v870_v38 = vpop.xlane.xlu0 %869 }
 0x144   : > { %v871_v43 = vadd.f32 %v870_v38, %v563_v40 }
 0x148   : > { %v874_v44 = vpop.xlane.xlu1 %873 }
 0x149   : > { %v866_v45 = vpop.xlane.xlu2 %865  ;;  %v875_v46 = vadd.f32 %v874_v44, %v871_v43 }
 0x14a   : > { %v867_v47 = vadd.f32 %v866_v45, %v864_v42 }
 0x14b   : > { %v889_v50 = vmul.f32 %v887_v48, %v875_v46 }
 0x14c   : > { %v888_v49 = vmul.f32 %v887_v48, %v867_v47 }
 0x14e   : > { %v890_v51 = vmul.f32 %v888_v49, %v888_v49 }
 0x150   : > { %v891_v52 = vsub.f32 %v889_v50, %v890_v51 }
 0x152   : > { %v892_v53 = vmax.f32 %v891_v52, 0.0 }
 0x154   : > { %v894_v54 = vadd.f32 1e-05, %v892_v53 }
 0x156   : > { %1506 = vrsqrt.f32 %v894_v54  ;;  %vm901_vm3 = vweird.f32 %v894_v54 }
 0x15c   : > { %v1507_v55 = vpop.eup %1506 }
 0x15d   : > { %v896_v56 = vmul.f32 %v1507_v55, %v894_v54  ;;  %vm902_vm2 = vweird.f32 %v1507_v55 }
 0x15e   : > { %vm903_vm4 = vmor %vm901_vm3, %vm902_vm2 }
 0x15f   : > { %v897_v57 = vmul.f32 %v1507_v55, %v896_v56 }
 0x161   : > { %v898_v58 = vmul.f32 0.5, %v897_v57 }
 0x163   : > { %v899_v59 = vsub.f32 1.5, %v898_v58 }
 0x165   : > { %v900_v61 = vmul.f32 %v1507_v55, %v899_v59 }
 0x167   : > { %v904_v62 = vsel %vm903_vm4, %v1507_v55, %v900_v61 }
 0x168   : > { %v905_v63 = vmul.f32 %v904_v62, %v893_v60 }
 0x16a   : > { %915 = vperm.xlu2 %1502, %v905_v63   ;;  %v907_v1 = vmul.f32 %v905_v63, %v888_v49 }
 0x16c   : > { %v908_v2 = vsub.f32 %v906_v0, %v907_v1 }
 0x16e   : > { %922 = vperm.xlu0 %1503, %v908_v2  }
 0x1c4   : > { %v916_v5 = vpop.permute.xlu2 %915 }
 0x1c5   : > { %v918_v15 = vmul.f32 %v1463_v6, %v916_v5  ;;  %v919_v16 = vmul.f32 %v1464_v7, %v916_v5  ;;  %v947_v17 = vmul.f32 %v1476_v8, %v916_v5  ;;  %v948_v18 = vmul.f32 %v1477_v9, %v916_v5 }
 0x1e0   : > { %v923_v19 = vpop.permute.xlu0 %922 }
 0x1e1   : > { %v925_v20 = vadd.f32 %v923_v19, %v918_v15  ;;  %v926_v21 = vadd.f32 %v923_v19, %v919_v16  ;;  %v949_v23 = vadd.f32 %v947_v17, %v923_v19  ;;  %v950_v24 = vadd.f32 %v948_v18, %v923_v19 }
 0x1e3   : > { %v931_v25 = vadd.f32 %v1467_v11, %v925_v20  ;;  %v932_v10 = vadd.f32 %v1468_v12, %v926_v21  ;;  %v956_v26 = vadd.f32 %v1480_v13, %v949_v23  ;;  %v957_v27 = vadd.f32 %v1481_v14, %v950_v24 }
 0x1e5   : > { %vm933_vm5 = vcmp.ge.f32.partialorder %v931_v25, 0.0  ;;  %vm934_vm6 = vcmp.ge.f32.partialorder %v932_v10, 0.0  ;;  %v935_v22 = vmul.f32 0.01, %v931_v25  ;;  %v936_v28 = vmul.f32 0.01, %v932_v10 }
 0x1e6   : > { %vm958_vm7 = vcmp.ge.f32.partialorder %v956_v26, 0.0  ;;  %vm959_vm8 = vcmp.ge.f32.partialorder %v957_v27, 0.0  ;;  %v960_v29 = vmul.f32 0.01, %v956_v26  ;;  %v961_v30 = vmul.f32 0.01, %v957_v27 }
 0x1e7   : > { %v937_v31 = vsel %vm933_vm5, %v931_v25, %v935_v22  ;;  %v938_v32 = vsel %vm934_vm6, %v932_v10, %v936_v28 }
 0x1e8   : > { %v1472_v33 = vpack.c.bf16 %v938_v32, %v937_v31  ;;  %v962_v34 = vsel %vm958_vm7, %v956_v26, %v960_v29  ;;  %v963_v35 = vsel %vm959_vm8, %v957_v27, %v961_v30 }
 0x1e9   : > { %v1485_v36 = vpack.c.bf16 %v963_v35, %v962_v34 }
 0x1ea   : > { %1473 = vst [vmem:[%s244_s11] sm:$0xff] %v1472_v33  }
 0x1eb   : > { %1490 = vst [vmem:[%s244_s11 + $0x8] sm:$0xff] %v1485_v36  }
 0x1ec PF: > { %s15_s18 = sadd.s32 1, %s1514_s18  }
 0x1ed   : > { %p12_p4 = scmp.ge.s32.totalorder %s15_s18, 4  }
 0x1ef   :  { %14 = sbr.rel (!%p12_p4) target bundleno = 1 (0x1), region = 78 }

// kernel: encoder_block_forward.4
= control target key start
LH: loop header
LB: loop body
LE: loop exit
PB: predicated region body
PF: predicated region fallthrough
CT: control target
= control target key end

     0   :  { %s1457_s15 = smov 0   ;;  %s1567_s0 = inlined_call_operand.vmem [shape: bf16[2,480,128], index: 0, kind: input, shape index: {}]   ;;  %s1568_s1 = inlined_call_operand.vmem [shape: bf16[8,240], index: 1, kind: input, shape index: {}]   ;;  %s1569_s2 = inlined_call_operand.vmem [shape: f32[8,1], index: 2, kind: input, shape index: {}]   ;;  %s1570_s3 = inlined_call_operand.vmem [shape: f32[8,1], index: 3, kind: input, shape index: {}]   ;;  %s1571_s4 = inlined_call_operand.vmem [shape: bf16[2,32,128], index: 4, kind: output, shape index: {}]  }
   0x1 LB: > { %s963_s16 = sadd.s32 4294967295, %s1428_s15   ;;  %p967_p0 = scmp.ge.s32.totalorder %s1428_s15, 1  ;;  %s1428_s15 = sphi %s1457_s15, %s14_s15  }
   0x2   : > { %p162_p1 = scmp.lt.s32.totalorder %s1428_s15, 3 }
   0x4   : > { %p163_p2 = pnand %p967_p0, %p162_p1 }
   0x5   : > { %p188_p3 = scmp.lt.s32.totalorder (!%p163_p2), %s963_s16, 1 }
   0x6   : > { %166 = sbr.rel (%p163_p2) target bundleno = 490 (0x1ea), region = 36 }
   0xb   : > { %s1573_s16 = smov (!%p188_p3, %s963_s16), 1  ;;  %v199_v24 = vld [vmem:[%s1568_s1] sm:$0xff]  ;;  %vm326_vm0 = vcmask 916480  }
   0xc   : > { %s1405_s17 = smul.u32 240, %s1573_s16  ;;  %v232_v27 = vunpack.c.h.b16 %v199_v24  ;;  %v231_v32 = vunpack.c.l.b16 %v199_v24  ;;  %s1313_s27 = sshll.u32 %s1573_s16, 4 }
   0xd   : > { %s197_s30 = scalar_lea.vmem %s1571_s4, %s1313_s27 }
   0xe   : > { %s1471_s20 = scalar_lea.vmem %s1567_s0, %s1405_s17  ;;  %v1507_v34 = vpack.c.b16 %v232_v27, %v232_v27  ;;  %v233_v40 = vpack.c.b16 %v231_v32, %v231_v32  ;;  %v1430_v27 = vmov 64.0  }
   0xf   : > { %v1321_v0 = vld [vmem:[%s1471_s20 + $0x38] sm:$0xff]  ;;  %v1328_v1 = vld [vmem:[%s1471_s20 + $0x70] sm:$0xff]  ;;  %v1336_v2 = vld [vmem:[%s1471_s20 + $0x60] sm:$0xff]  ;;  %1418 = vrcp.f32 %v1430_v27 }
  0x10   : > { %v1343_v3 = vld [vmem:[%s1471_s20 + $0x98] sm:$0xff]  ;;  %330 = vmatpush.bf16.msra.mxu0 %v1321_v0  ;;  %344 = vmatpush.bf16.msra.mxu1 %v1328_v1  ;;  %v1320_v4 = vld [vmem:[%s1471_s20 + $0x30] sm:$0xff]  ;;  %v1327_v5 = vld [vmem:[%s1471_s20 + $0x68] sm:$0xff] }
  0x11   : > { %477 = vmatpush.bf16.msra.mxu2 %v1336_v2  ;;  %491 = vmatpush.bf16.msra.mxu3 %v1343_v3  ;;  %v1335_v6 = vld [vmem:[%s1471_s20 + $0x58] sm:$0xff]  ;;  %v1342_v7 = vld [vmem:[%s1471_s20 + $0x90] sm:$0xff]  ;;  %v1319_v8 = vld [vmem:[%s1471_s20 + $0x28] sm:$0xff] }
  0x12   : > { %v1326_v9 = vld [vmem:[%s1471_s20 + $0x60] sm:$0xff]  ;;  %v1334_v10 = vld [vmem:[%s1471_s20 + $0x50] sm:$0xff]  ;;  %v1341_v11 = vld [vmem:[%s1471_s20 + $0x88] sm:$0xff] }
  0x13   : > { %v1318_v12 = vld [vmem:[%s1471_s20 + $0x20] sm:$0xff]  ;;  %v1325_v13 = vld [vmem:[%s1471_s20 + $0x58] sm:$0xff]  ;;  %v1333_v14 = vld [vmem:[%s1471_s20 + $0x48] sm:$0xff] }
  0x14   : > { %331 = vmatpush.bf16.msra.mxu0 %v1320_v4  ;;  %345 = vmatpush.bf16.msra.mxu1 %v1327_v5  ;;  %v1340_v15 = vld [vmem:[%s1471_s20 + $0x80] sm:$0xff]  ;;  %v1317_v16 = vld [vmem:[%s1471_s20 + $0x18] sm:$0xff]  ;;  %v1324_v17 = vld [vmem:[%s1471_s20 + $0x50] sm:$0xff] }
  0x15   : > { %478 = vmatpush.bf16.msra.mxu2 %v1335_v6  ;;  %492 = vmatpush.bf16.msra.mxu3 %v1342_v7  ;;  %v1332_v18 = vld [vmem:[%s1471_s20 + $0x40] sm:$0xff]  ;;  %v1339_v19 = vld [vmem:[%s1471_s20 + $0x78] sm:$0xff]  ;;  %v1316_v20 = vld [vmem:[%s1471_s20 + $0x10] sm:$0xff] }
  0x16   : > { %v1323_v21 = vld [vmem:[%s1471_s20 + $0x48] sm:$0xff]  ;;  %v1331_v22 = vld [vmem:[%s1471_s20 + $0x38] sm:$0xff]  ;;  %v1338_v23 = vld [vmem:[%s1471_s20 + $0x70] sm:$0xff] }
  0x17   : > { %v1315_v25 = vld [vmem:[%s1471_s20 + $0x8] sm:$0xff]  ;;  %v1322_v26 = vld [vmem:[%s1471_s20 + $0x40] sm:$0xff]  ;;  %v1330_v28 = vld [vmem:[%s1471_s20 + $0x30] sm:$0xff] }
  0x18   : > { %332 = vmatpush.bf16.msra.mxu0 %v1319_v8  ;;  %346 = vmatpush.bf16.msra.mxu1 %v1326_v9  ;;  %v1337_v29 = vld [vmem:[%s1471_s20 + $0x68] sm:$0xff]  ;;  %v1358_v31 = vld [vmem:[%s1471_s20 + $0xc0] sm:$0xff]  ;;  %v1366_v36 = vld [vmem:[%s1471_s20 + $0xb0] sm:$0xff] }
  0x19   : > { %479 = vmatpush.bf16.msra.mxu2 %v1334_v10  ;;  %493 = vmatpush.bf16.msra.mxu3 %v1341_v11  ;;  %v1351_v30 = vld [vmem:[%s1471_s20 + $0x88] sm:$0xff]  ;;  %v1314_v33 = vld [vmem:[%s1471_s20] sm:$0xff]  ;;  %v1357_v38 = vld [vmem:[%s1471_s20 + $0xb8] sm:$0xff] }
  0x1a   : > { %v1329_v35 = vld [vmem:[%s1471_s20 + $0x28] sm:$0xff]  ;;  %v1350_v37 = vld [vmem:[%s1471_s20 + $0x80] sm:$0xff]  ;;  %v1349_v42 = vld [vmem:[%s1471_s20 + $0x78] sm:$0xff] }
  0x1b   : > { %v1373_v39 = vld [vmem:[%s1471_s20 + $0xe8] sm:$0xff]  ;;  %v1356_v43 = vld [vmem:[%s1471_s20 + $0xb0] sm:$0xff]  ;;  %v1372_v44 = vld [vmem:[%s1471_s20 + $0xe0] sm:$0xff] }
  0x1c   : > { %333 = vmatpush.bf16.msra.mxu0 %v1318_v12  ;;  %347 = vmatpush.bf16.msra.mxu1 %v1325_v13  ;;  %v1365_v41 = vld [vmem:[%s1471_s20 + $0xa8] sm:$0xff]  ;;  %v1364_v45 = vld [vmem:[%s1471_s20 + $0xa0] sm:$0xff]  ;;  %v1348_v46 = vld [vmem:[%s1471_s20 + $0x70] sm:$0xff] }
  0x1d   : > { %480 = vmatpush.bf16.msra.mxu2 %v1333_v14  ;;  %494 = vmatpush.bf16.msra.mxu3 %v1340_v15  ;;  %v1355_v47 = vld [vmem:[%s1471_s20 + $0xa8] sm:$0xff]  ;;  %v1371_v48 = vld [vmem:[%s1471_s20 + $0xd8] sm:$0xff]  ;;  %v1354_v51 = vld [vmem:[%s1471_s20 + $0xa0] sm:$0xff] }
  0x1e   : > { %v1363_v49 = vld [vmem:[%s1471_s20 + $0x98] sm:$0xff]  ;;  %v1347_v50 = vld [vmem:[%s1471_s20 + $0x68] sm:$0xff]  ;;  %v1370_v52 = vld [vmem:[%s1471_s20 + $0xd0] sm:$0xff] }
  0x1f   : > { %v1362_v53 = vld [vmem:[%s1471_s20 + $0x90] sm:$0xff]  ;;  %v1346_v54 = vld [vmem:[%s1471_s20 + $0x60] sm:$0xff]  ;;  %v1353_v55 = vld [vmem:[%s1471_s20 + $0x98] sm:$0xff] }
  0x20   : > { %334 = vmatpush.bf16.msra.mxu0 %v1317_v16  ;;  %348 = vmatpush.bf16.msra.mxu1 %v1324_v17  ;;  %v1369_v56 = vld [vmem:[%s1471_s20 + $0xc8] sm:$0xff]  ;;  %v1345_v58 = vld [vmem:[%s1471_s20 + $0x58] sm:$0xff]  ;;  %v1352_v59 = vld [vmem:[%s1471_s20 + $0x90] sm:$0xff] }
  0x21   : > { %481 = vmatpush.bf16.msra.mxu2 %v1332_v18  ;;  %495 = vmatpush.bf16.msra.mxu3 %v1339_v19  ;;  %v1361_v57 = vld [vmem:[%s1471_s20 + $0x88] sm:$0xff]  ;;  %v1368_v60 = vld [vmem:[%s1471_s20 + $0xc0] sm:$0xff]  ;;  %v1344_v62 = vld [vmem:[%s1471_s20 + $0x50] sm:$0xff] }
  0x22   : > { %v1360_v61 = vld [vmem:[%s1471_s20 + $0x80] sm:$0xff]  ;;  %v1367_v63 = vld [vmem:[%s1471_s20 + $0xb8] sm:$0xff] }
  0x23   : > { %v1359_v0 = vld [vmem:[%s1471_s20 + $0x78] sm:$0xff] }
  0x24   : > { %335 = vmatpush.bf16.msra.mxu0 %v1316_v20  ;;  %349 = vmatpush.bf16.msra.mxu1 %v1323_v21 }
  0x25   : > { %482 = vmatpush.bf16.msra.mxu2 %v1331_v22  ;;  %496 = vmatpush.bf16.msra.mxu3 %v1338_v23 }
  0x28   : > { %336 = vmatpush.bf16.msra.mxu0 %v1315_v25  ;;  %350 = vmatpush.bf16.msra.mxu1 %v1322_v26 }
  0x29   : > { %483 = vmatpush.bf16.msra.mxu2 %v1330_v28  ;;  %497 = vmatpush.bf16.msra.mxu3 %v1337_v29 }
  0x2b   : > { %1031 = vmatmul.msk.bf16.vlgmr.msra.gmra.mxu1 %vm326_vm0, %v1507_v34 }
  0x2c   : > { %642 = vmatpush.bf16.msrb.mxu1 %v1351_v30  ;;  %337 = vmatpush.bf16.msra.mxu0 %v1314_v33  ;;  %v1419_v30 = vpop.eup %1418  ;;  %v1431_v33 = vmov 0  }
  0x2d   : > { %656 = vmatpush.bf16.msrb.mxu3 %v1358_v31  ;;  %484 = vmatpush.bf16.msra.mxu2 %v1329_v35  ;;  %v835_v31 = vmul.f32 64.0, %v1419_v30  ;;  %vm839_vm1 = vweird.f32 %v1419_v30 }
  0x2e   : > { %1122 = vmatmul.msk.bf16.vlgmr.msra.gmra.mxu3 %vm326_vm0, %v1507_v34  ;;  %1416 = vset.pattern.permute.xlu2 %v1431_v33 }
  0x2f   : > { %338 = vmatmul.bf16.vlgmr.msra.gmra.mxu0 %v233_v40  ;;  %1417 = vset.pattern.permute.xlu0 %v1431_v33 }
  0x30   : > { %789 = vmatpush.bf16.msrb.mxu0 %v1366_v36  ;;  %643 = vmatpush.bf16.msrb.mxu1 %v1350_v37 }
  0x31   : > { %657 = vmatpush.bf16.msrb.mxu3 %v1357_v38  ;;  %803 = vmatpush.bf16.msrb.mxu2 %v1373_v39 }
  0x32   : > { %485 = vmatmul.bf16.vlgmr.msra.gmra.mxu2 %v233_v40 }
  0x34   : > { %790 = vmatpush.bf16.msrb.mxu0 %v1365_v41  ;;  %644 = vmatpush.bf16.msrb.mxu1 %v1349_v42 }
  0x35   : > { %658 = vmatpush.bf16.msrb.mxu3 %v1356_v43  ;;  %804 = vmatpush.bf16.msrb.mxu2 %v1372_v44 }
  0x38   : > { %791 = vmatpush.bf16.msrb.mxu0 %v1364_v45  ;;  %645 = vmatpush.bf16.msrb.mxu1 %v1348_v46 }
  0x39   : > { %659 = vmatpush.bf16.msrb.mxu3 %v1355_v47  ;;  %805 = vmatpush.bf16.msrb.mxu2 %v1371_v48 }
  0x3c   : > { %792 = vmatpush.bf16.msrb.mxu0 %v1363_v49  ;;  %646 = vmatpush.bf16.msrb.mxu1 %v1347_v50 }
  0x3d   : > { %660 = vmatpush.bf16.msrb.mxu3 %v1354_v51  ;;  %806 = vmatpush.bf16.msrb.mxu2 %v1370_v52 }
  0x40   : > { %793 = vmatpush.bf16.msrb.mxu0 %v1362_v53  ;;  %647 = vmatpush.bf16.msrb.mxu1 %v1346_v54 }
  0x41   : > { %661 = vmatpush.bf16.msrb.mxu3 %v1353_v55  ;;  %807 = vmatpush.bf16.msrb.mxu2 %v1369_v56 }
  0x44   : > { %794 = vmatpush.bf16.msrb.mxu0 %v1361_v57  ;;  %648 = vmatpush.bf16.msrb.mxu1 %v1345_v58 }
  0x45   : > { %662 = vmatpush.bf16.msrb.mxu3 %v1352_v59  ;;  %808 = vmatpush.bf16.msrb.mxu2 %v1368_v60  ;;  %v846_v60 = vld [vmem:[%s1569_s2] sm:$0xff] }
  0x48   : > { %1213 = vmatmul.msk.bf16.vlgmr.msrb.gmra.mxu3 %vm326_vm0, %v1507_v34  ;;  %795 = vmatpush.bf16.msrb.mxu0 %v1360_v61 }
  0x49   : > { %649 = vmatpush.bf16.msrb.mxu1 %v1344_v62  ;;  %809 = vmatpush.bf16.msrb.mxu2 %v1367_v63 }
  0x4c   : > { %650 = vmatmul.bf16.vlgmr.msrb.gmra.mxu1 %v233_v40  ;;  %796 = vmatpush.bf16.msrb.mxu0 %v1359_v0  ;;  %v859_v0 = vld [vmem:[%s1570_s3] sm:$0xff] }
  0x4d   : > { %1304 = vmatmul.msk.bf16.vlgmr.msrb.gmra.mxu2 %vm326_vm0, %v1507_v34  ;;  %v836_v34 = vsub.f32 1.0, %v835_v31 }
  0x4f   : > { %797 = vmatmul.bf16.vlgmr.msrb.gmra.mxu0 %v233_v40  ;;  %v837_v37 = vmul.f32 %v1419_v30, %v836_v34 }
  0x51   : > { %v838_v41 = vadd.f32 %v1419_v30, %v837_v37 }
  0x53   : > { %v840_v48 = vsel %vm839_vm1, %v1419_v30, %v838_v41 }
  0xa8   : > { %v352_v1 = vpop.f32.mrf.mxu1 }
  0xac   : > { %v339_v2 = vpop.f32.mrf.mxu0 }
  0xad   : > { %v353_v3 = vadd.f32 %v352_v1, %v339_v2 }
  0xaf   : > { %503 = vadd.xlane.f32.xlu0 %v353_v3  ;;  %v509_v5 = vmul.f32 %v353_v3, %v353_v3 }
  0xb0   : > { %v354_v6 = vpop.f32.mrf.mxu1 }
  0xb1   : > { %v499_v4 = vpop.f32.mrf.mxu3  ;;  %510 = vadd.xlane.f32.xlu1 %v509_v5 }
  0xb4   : > { %v341_v9 = vpop.f32.mrf.mxu0 }
  0xb5   : > { %v486_v7 = vpop.f32.mrf.mxu2 }
  0xb6   : > { %v500_v8 = vadd.f32 %v499_v4, %v486_v7 }
  0xb8   : > { %v1546_v10 = vpack.c.bf16 %v500_v8, %v353_v3  ;;  %v513_v11 = vmul.f32 %v500_v8, %v500_v8  ;;  %506 = vadd.xlane.f32.xlu0 %v500_v8 }
  0xb9   : > { %v501_v12 = vpop.f32.mrf.mxu3 }
  0xba   : > { %514 = vadd.xlane.f32.xlu1 %v513_v11  ;;  %v1386_v4 = vunpack.c.l.bf16 %v1546_v10  ;;  %v1387_v5 = vunpack.c.h.bf16 %v1546_v10 }
  0xbd   : > { %v488_v13 = vpop.f32.mrf.mxu2 }
  0xc9   : > { %v651_v14 = vpop.f32.mrf.mxu1 }
  0xcb   : > { %v664_v15 = vpop.f32.mrf.mxu3 }
  0xcc   : > { %v665_v16 = vadd.f32 %v664_v15, %v651_v14  ;;  %v798_v17 = vpop.f32.mrf.mxu0 }
  0xce   : > { %815 = vadd.xlane.f32.xlu2 %v665_v16  ;;  %v821_v18 = vmul.f32 %v665_v16, %v665_v16 }
  0xd0   : > { %v811_v19 = vpop.f32.mrf.mxu2  ;;  %822 = vadd.xlane.f32.xlu0 %v821_v18 }
  0xd1   : > { %v812_v20 = vadd.f32 %v811_v19, %v798_v17  ;;  %v653_v21 = vpop.f32.mrf.mxu1 }
  0xd3   : > { %v1548_v22 = vpack.c.bf16 %v812_v20, %v665_v16  ;;  %v666_v23 = vpop.f32.mrf.mxu3  ;;  %v825_v24 = vmul.f32 %v812_v20, %v812_v20 }
  0xd4   : > { %v800_v25 = vpop.f32.mrf.mxu0 }
  0xd5   : > { %826 = vadd.xlane.f32.xlu1 %v825_v24  ;;  %v1395_v6 = vunpack.c.l.bf16 %v1548_v22  ;;  %v1396_v7 = vunpack.c.h.bf16 %v1548_v22 }
  0xd6   : > { %818 = vadd.xlane.f32.xlu2 %v812_v20 }
  0xd8   : > { %v813_v26 = vpop.f32.mrf.mxu2 }
 0x122   : > { %v504_v28 = vpop.xlane.xlu0 %503 }
 0x124   : > { %v511_v29 = vpop.xlane.xlu1 %510 }
 0x12b   : > { %v507_v32 = vpop.xlane.xlu0 %506 }
 0x12c   : > { %v508_v39 = vadd.f32 %v507_v32, %v504_v28 }
 0x12d   : > { %v515_v35 = vpop.xlane.xlu1 %514 }
 0x12e   : > { %v516_v40 = vadd.f32 %v515_v35, %v511_v29 }
 0x141   : > { %v816_v36 = vpop.xlane.xlu2 %815 }
 0x142   : > { %v817_v42 = vadd.f32 %v816_v36, %v508_v39 }
 0x143   : > { %v823_v38 = vpop.xlane.xlu0 %822 }
 0x144   : > { %v824_v43 = vadd.f32 %v823_v38, %v516_v40 }
 0x148   : > { %v827_v44 = vpop.xlane.xlu1 %826 }
 0x149   : > { %v819_v45 = vpop.xlane.xlu2 %818  ;;  %v828_v46 = vadd.f32 %v827_v44, %v824_v43 }
 0x14a   : > { %v820_v47 = vadd.f32 %v819_v45, %v817_v42 }
 0x14b   : > { %v842_v50 = vmul.f32 %v840_v48, %v828_v46 }
 0x14c   : > { %v841_v49 = vmul.f32 %v840_v48, %v820_v47 }
 0x14e   : > { %v843_v51 = vmul.f32 %v841_v49, %v841_v49 }
 0x150   : > { %v844_v52 = vsub.f32 %v842_v50, %v843_v51 }
 0x152   : > { %v845_v53 = vmax.f32 %v844_v52, 0.0 }
 0x154   : > { %v847_v54 = vadd.f32 1e-05, %v845_v53 }
 0x156   : > { %1420 = vrsqrt.f32 %v847_v54  ;;  %vm854_vm3 = vweird.f32 %v847_v54 }
 0x15c   : > { %v1421_v55 = vpop.eup %1420 }
 0x15d   : > { %v849_v56 = vmul.f32 %v1421_v55, %v847_v54  ;;  %vm855_vm2 = vweird.f32 %v1421_v55 }
 0x15e   : > { %vm856_vm4 = vmor %vm854_vm3, %vm855_vm2 }
 0x15f   : > { %v850_v57 = vmul.f32 %v1421_v55, %v849_v56 }
 0x161   : > { %v851_v58 = vmul.f32 0.5, %v850_v57 }
 0x163   : > { %v852_v59 = vsub.f32 1.5, %v851_v58 }
 0x165   : > { %v853_v61 = vmul.f32 %v1421_v55, %v852_v59 }
 0x167   : > { %v857_v62 = vsel %vm856_vm4, %v1421_v55, %v853_v61 }
 0x168   : > { %v858_v63 = vmul.f32 %v857_v62, %v846_v60 }
 0x16a   : > { %868 = vperm.xlu2 %1416, %v858_v63   ;;  %v860_v1 = vmul.f32 %v858_v63, %v841_v49 }
 0x16c   : > { %v861_v2 = vsub.f32 %v859_v0, %v860_v1 }
 0x16e   : > { %875 = vperm.xlu0 %1417, %v861_v2  }
 0x1c4   : > { %v869_v3 = vpop.permute.xlu2 %868 }
 0x1c5   : > { %v871_v8 = vmul.f32 %v1386_v4, %v869_v3  ;;  %v872_v9 = vmul.f32 %v1387_v5, %v869_v3  ;;  %v894_v11 = vmul.f32 %v1395_v6, %v869_v3  ;;  %v895_v12 = vmul.f32 %v1396_v7, %v869_v3 }
 0x1e0   : > { %v876_v13 = vpop.permute.xlu0 %875 }
 0x1e1   : > { %v878_v14 = vadd.f32 %v876_v13, %v871_v8  ;;  %v879_v15 = vadd.f32 %v876_v13, %v872_v9  ;;  %v896_v16 = vadd.f32 %v894_v11, %v876_v13  ;;  %v897_v17 = vadd.f32 %v895_v12, %v876_v13 }
 0x1e3   : > { %vm880_vm5 = vcmp.ge.f32.partialorder %v878_v14, 0.0  ;;  %vm881_vm6 = vcmp.ge.f32.partialorder %v879_v15, 0.0  ;;  %v882_v18 = vmul.f32 0.01, %v878_v14  ;;  %v883_v19 = vmul.f32 0.01, %v879_v15 }
 0x1e4   : > { %vm898_vm7 = vcmp.ge.f32.partialorder %v896_v16, 0.0  ;;  %vm899_vm8 = vcmp.ge.f32.partialorder %v897_v17, 0.0  ;;  %v900_v10 = vmul.f32 0.01, %v896_v16  ;;  %v901_v20 = vmul.f32 0.01, %v897_v17 }
 0x1e5   : > { %v884_v21 = vsel %vm880_vm5, %v878_v14, %v882_v18  ;;  %v885_v22 = vsel %vm881_vm6, %v879_v15, %v883_v19 }
 0x1e6   : > { %v1391_v23 = vpack.c.bf16 %v885_v22, %v884_v21  ;;  %v902_v24 = vsel %vm898_vm7, %v896_v16, %v900_v10  ;;  %v903_v25 = vsel %vm899_vm8, %v897_v17, %v901_v20 }
 0x1e7   : > { %v1400_v26 = vpack.c.bf16 %v903_v25, %v902_v24 }
 0x1e8   : > { %1392 = vst [vmem:[%s197_s30] sm:$0xff] %v1391_v23  }
 0x1e9   : > { %1404 = vst [vmem:[%s197_s30 + $0x8] sm:$0xff] %v1400_v26  }
 0x1ea PF: > { %s14_s15 = sadd.s32 1, %s1428_s15  }
 0x1eb   : > { %p11_p4 = scmp.ge.s32.totalorder %s14_s15, 4  }
 0x1ed   :  { %13 = sbr.rel (!%p11_p4) target bundleno = 1 (0x1), region = 70 }

</bundles_post_ra>
